<compile_context>
chip_gen: v5e
topology: v5e:2x2
jax: 0.10.0
libtpu: 0.0.40
codegen_flags: <defaults>
</compile_context>

<pallas_src>
import functools

import jax
import jax.numpy as jnp
from jax.experimental import pallas as pl
from jax.experimental.pallas import tpu as pltpu


# ---------------------------------------------------------------------------
# Single fused kernel: LN + 1x1 convs + depthwise 3x3 conv + channel attention
# ---------------------------------------------------------------------------
def _fused_cross_mhsa_kernel(xq_ref, xk_ref, w1_ref, b1_ref, wdw_ref,
                             trow_ref, bias_ref, wpk_ref, o_ref, *, H, W):
    f32 = jnp.float32
    bf16 = jnp.bfloat16
    C, HW = xq_ref.shape
    C3 = 3 * C
    pack = wpk_ref.shape[0]

    # ---- Stage 1: per-pixel channel standardization (WithBias LayerNorm; gamma/beta
    #      are folded into the 1x1-conv weights/bias at parameter-fold time). ----------
    def standardize(x):                                    # x: (C, HW); stats over channels
        mu = jnp.mean(x, axis=0, keepdims=True)
        xc = x - mu
        var = jnp.mean(xc * xc, axis=0, keepdims=True)     # unbiased=False
        return xc * jax.lax.rsqrt(var + 1e-5)

    xq = xq_ref[...].astype(f32)       # cast after DMA (inputs stay in native dtype)
    xk = xk_ref[...].astype(f32)
    x2 = jnp.concatenate([standardize(xq), standardize(xk)], axis=0)      # (2C, HW) f32

    # ---- Stage 2: fused q / kv 1x1 convs as ONE MXU matmul (bf16 in, f32 acc).
    #      Contracting over dim 0 folds the channels-major -> channels-last transpose in.
    x3 = jax.lax.dot_general(x2.astype(bf16), w1_ref[...],
                             (((0,), (0,)), ((), ())),
                             preferred_element_type=f32) + b1_ref[...]    # (HW, 3C) f32

    # ---- Stage 3: depthwise 3x3 conv, padding=1, fully in value space (no scratch,
    #      no zero-fill stores, no unaligned read-modify-write of VMEM tiles). ---------
    xc3 = x3.reshape(H, W, C3)                             # leading-dim split (free)
    zcol = jnp.zeros((H, 1, C3), f32)
    x_l = jnp.concatenate([zcol, xc3[:, :W - 1, :]], axis=1)              # x[h, w-1]
    x_r = jnp.concatenate([xc3[:, 1:, :], zcol], axis=1)                  # x[h, w+1]
    shifted = (x_l, xc3, x_r)                              # dx = 0, 1, 2

    wdw = wdw_ref[...]                                     # (9, 3C), tap idx = 3*dy + dx
    taps = [wdw[i:i + 1, :] for i in range(9)]             # pre-sliced (1, 3C) rows

    def row_sum(dy):                                       # sum over dx for kernel row dy
        return (shifted[0] * taps[3 * dy + 0]
                + shifted[1] * taps[3 * dy + 1]
                + shifted[2] * taps[3 * dy + 2])

    r0, r1, r2 = row_sum(0), row_sum(1), row_sum(2)
    zrow = jnp.zeros((1, W, C3), f32)
    y = (r1
         + jnp.concatenate([zrow, r0[:H - 1]], axis=0)     # contributions from x[h-1, :]
         + jnp.concatenate([r2[1:], zrow], axis=0)         # contributions from x[h+1, :]
         ).reshape(HW, C3)                                 # channels-last, leading merge

    # ---- Stage 4: per-head channel attention, all heads in one pass. -----------------
    q = y[:, :C]
    k = y[:, C:2 * C]
    v = y[:, 2 * C:]

    # F.normalize(dim=-1) over HW (axis 0 here); temperature folded into q's scale.
    q_scale = trow_ref[...] * jax.lax.rsqrt(
        jnp.maximum(jnp.sum(q * q, axis=0, keepdims=True), 1e-24))        # (1, C)
    k_scale = jax.lax.rsqrt(
        jnp.maximum(jnp.sum(k * k, axis=0, keepdims=True), 1e-24))        # (1, C)
    qs = (q * q_scale).astype(bf16)
    ks = (k * k_scale).astype(bf16)

    # Full (C, C) Gram matrix on the MXU (bf16 in, f32 acc); additive block-diagonal
    # mask keeps the softmax within each head (off-head logits -> -1e30 -> prob 0).
    attn = jax.lax.dot_general(qs, ks, (((0,), (0,)), ((), ())),
                               preferred_element_type=f32) + bias_ref[...]
    attn = attn - jnp.max(attn, axis=-1, keepdims=True)                   # f32 softmax
    e = jnp.exp(attn)
    p = e * pl.reciprocal(jnp.sum(e, axis=-1, keepdims=True), approx=True)

    # attn @ v, with the channels-last -> channels-major transpose folded in.
    out_cm = jax.lax.dot_general(p.astype(bf16), v.astype(bf16),
                                 (((1,), (1,)), ((), ())),
                                 preferred_element_type=f32)              # (C, HW) f32

    # project_out (1x1 conv), emitted as `pack` row-strided pieces so the stored block is
    # lane-dense: output row i = channels (pack*i .. pack*i + pack-1), i.e. exactly the
    # row-major NCHW flattening (the wrapper reshape back to (B, C, H, W) is free).
    out_bf = out_cm.astype(bf16)
    segs = [jnp.dot(wpk_ref[s], out_bf, preferred_element_type=f32) for s in range(pack)]
    res = segs[0] if pack == 1 else jnp.concatenate(segs, axis=1)         # (C/pack, pack*HW)
    o_ref[...] = res.astype(o_ref.dtype)


# ---------------------------------------------------------------------------
# One-time parameter folding (call at module init, NOT inside the forward path)
# ---------------------------------------------------------------------------
def fold_cross_mhsa_params(params, num_heads, image_hw):
    f32, bf16 = jnp.float32, jnp.bfloat16
    C = params['wq'].shape[0]
    assert C % num_heads == 0
    ch = C // num_heads
    C3 = 3 * C

    gq, bq = params['gq'].astype(f32), params['bq'].astype(f32)
    gk, bk = params['gk'].astype(f32), params['bk'].astype(f32)
    wq, wkv = params['wq'].astype(f32), params['wkv'].astype(f32)

    # LayerNorm gamma folded into the 1x1-conv weights, beta into a conv bias; q and kv
    # convs packed into one block matrix so a single matmul yields (HW, 3C).
    w1 = jnp.zeros((2 * C, C3), f32)
    w1 = w1.at[:C, :C].set(wq.T * gq[:, None])
    w1 = w1.at[C:, C:].set(wkv.T * gk[:, None])
    b1 = jnp.concatenate([wq @ bq, wkv @ bk])[None, :]                    # (1, 3C) f32

    # Depthwise 3x3 weights, channels-last, tap index = 3*dy + dx.
    wdw = jnp.concatenate([params['wq_dw'], params['wkv_dw']], axis=0)    # (3C, 3, 3)
    wdw = wdw.transpose(1, 2, 0).reshape(9, C3).astype(f32)

    # Temperature expanded per channel (folded into the q L2-norm scale in-kernel).
    trow = jnp.repeat(params['temp'].reshape(num_heads), ch)[None, :].astype(f32)

    # Block-diagonal additive mask keeping the softmax within each head.
    head_ids = jnp.arange(C, dtype=jnp.int32) // ch
    bias = jnp.where(head_ids[:, None] == head_ids[None, :], 0.0, -1e30).astype(f32)

    # Lane-dense output packing: pack consecutive channels into one output row so the
    # stored block's last dim reaches 128 lanes when HW < 128.
    pack = 1
    if image_hw < 128:
        cand = 128 // image_hw
        if cand >= 1 and C % cand == 0:
            pack = cand
    wp = params['wproj'].astype(f32)
    wpk = jnp.stack([wp[s::pack, :] for s in range(pack)], axis=0).astype(bf16)

    return {'w1': w1.astype(bf16), 'b1': b1, 'wdw': wdw, 'trow': trow, 'bias': bias,
            'wpk': wpk, 'pack': pack, 'hw': image_hw, 'dim': C}


# ---------------------------------------------------------------------------
# Wrapper: NCHW in -> NCHW out (only free metadata reshapes outside the kernel)
# ---------------------------------------------------------------------------
def cross_mhsa_forward(q_nchw, k_nchw, folded, num_heads):
    B, C, H, W = q_nchw.shape
    HW = H * W
    assert C == folded['dim'] and HW == folded['hw'], "fold params for this image size"
    pack = folded['pack']
    C3 = 3 * C

    # Free reshapes only; inputs stay in their native dtype (cast after DMA, in-kernel).
    xq = q_nchw.reshape(B, C, HW)
    xk = k_nchw.reshape(B, C, HW)

    # VMEM budget check for the whole-image-per-step design, with v7x (64 MiB/TC) headroom.
    # TODO(synk): add an H-row-tiled path for large images instead of asserting.
    itemsize = jnp.dtype(q_nchw.dtype).itemsize
    blk_bytes = (2 * C * HW * itemsize + C * HW * 4                       # in/out blocks
                 + 2 * C * C3 * 2 + 10 * C3 * 4 + C * 4 + C * C * 6)      # constants
    work_bytes = 16 * HW * C3 * 4                                         # live intermediates
    vmem_needed = 2 * blk_bytes + work_bytes
    assert vmem_needed < 48 * 2 ** 20, "image too large for the single-block kernel"
    vmem_limit = int(min(48 * 2 ** 20, max(16 * 2 ** 20, 2 * vmem_needed)))

    def img_spec():
        return pl.BlockSpec((None, C, HW), lambda b: (b, 0, 0))

    def const_spec(shape):
        nd = len(shape)
        return pl.BlockSpec(shape, lambda b, _n=nd: (0,) * _n)

    out = pl.pallas_call(
        functools.partial(_fused_cross_mhsa_kernel, H=H, W=W),
        out_shape=jax.ShapeDtypeStruct((B, C // pack, pack * HW), q_nchw.dtype),
        grid=(B,),                      # B >= 2 keeps both v7x TensorCores busy
        in_specs=[img_spec(), img_spec(),
                  const_spec((2 * C, C3)), const_spec((1, C3)), const_spec((9, C3)),
                  const_spec((1, C)), const_spec((C, C)),
                  const_spec(folded['wpk'].shape)],
        out_specs=pl.BlockSpec((None, C // pack, pack * HW), lambda b: (b, 0, 0)),
        compiler_params=pltpu.CompilerParams(
            dimension_semantics=("parallel",),
            vmem_limit_bytes=vmem_limit),
    )(xq, xk, folded['w1'], folded['b1'], folded['wdw'],
      folded['trow'], folded['bias'], folded['wpk'])

    # Row-major flatten of (C/pack, pack*HW) is exactly NCHW channel order -> free reshape.
    return out.reshape(B, C, H, W)


# ---------------------------------------------------------------------------
# Pure-JAX reference mirroring the PyTorch forward (for self-check)
# ---------------------------------------------------------------------------
def cross_mhsa_reference(q_nchw, k_nchw, params, num_heads):
    B, C, H, W = q_nchw.shape
    HW = H * W
    P = jax.lax.Precision.HIGHEST

    def ln(x, g, b):
        xt = x.reshape(B, C, HW).transpose(0, 2, 1)
        mu = xt.mean(-1, keepdims=True)
        var = ((xt - mu) ** 2).mean(-1, keepdims=True)
        y = (xt - mu) / jnp.sqrt(var + 1e-5) * g + b
        return y.transpose(0, 2, 1).reshape(B, C, H, W)

    qn = ln(q_nchw, params['gq'], params['bq'])
    kn = ln(k_nchw, params['gk'], params['bk'])
    q1 = jnp.einsum('oc,bchw->bohw', params['wq'], qn, precision=P)
    kv1 = jnp.einsum('oc,bchw->bohw', params['wkv'], kn, precision=P)

    def dwconv(x, wdw):
        return jax.lax.conv_general_dilated(
            x, wdw[:, None, :, :], (1, 1), ((1, 1), (1, 1)),
            dimension_numbers=('NCHW', 'OIHW', 'NCHW'),
            feature_group_count=x.shape[1], precision=P)

    q2 = dwconv(q1, params['wq_dw'])
    kv2 = dwconv(kv1, params['wkv_dw'])
    k2, v2 = kv2[:, :C], kv2[:, C:]

    def heads(x):
        return x.reshape(B, num_heads, C // num_heads, HW)

    qh, kh, vh = heads(q2), heads(k2), heads(v2)

    def l2(x):
        return x / jnp.maximum(jnp.sqrt(jnp.sum(x * x, -1, keepdims=True)), 1e-12)

    qh, kh = l2(qh), l2(kh)
    attn = jnp.einsum('bhcn,bhdn->bhcd', qh, kh, precision=P)
    attn = attn * params['temp'][None, :, None, None]
    attn = jax.nn.softmax(attn, axis=-1)
    out = jnp.einsum('bhcd,bhdn->bhcn', attn, vh, precision=P)
    out = out.reshape(B, C, H, W)
    return jnp.einsum('oc,bchw->bohw', params['wproj'], out, precision=P)


if __name__ == "__main__":
    B, C, H, W = 2, 32, 8, 8        # dim=32
    num_heads = 4
    f32 = jnp.float32

    key = jax.random.PRNGKey(0)
    ks = jax.random.split(key, 12)
    # Deterministic synthetic parameters (module has bias=False on all convs).
    params = {
        'gq': 1.0 + 0.1 * jax.random.normal(ks[0], (C,), f32),        # norm_q weight
        'bq': 0.05 * jax.random.normal(ks[1], (C,), f32),             # norm_q bias
        'gk': 1.0 + 0.1 * jax.random.normal(ks[2], (C,), f32),        # norm_k weight
        'bk': 0.05 * jax.random.normal(ks[3], (C,), f32),             # norm_k bias
        'wq': 0.2 * jax.random.normal(ks[4], (C, C), f32),            # q 1x1 conv (out,in)
        'wkv': 0.2 * jax.random.normal(ks[5], (2 * C, C), f32),       # kv 1x1 conv (out,in)
        'wq_dw': 0.2 * jax.random.normal(ks[6], (C, 3, 3), f32),      # q depthwise 3x3
        'wkv_dw': 0.2 * jax.random.normal(ks[7], (2 * C, 3, 3), f32), # kv depthwise 3x3
        'wproj': 0.2 * jax.random.normal(ks[8], (C, C), f32),         # project_out (out,in)
        'temp': 1.0 + 0.1 * jax.random.normal(ks[9], (num_heads,), f32),
    }
    q_in = jax.random.normal(ks[10], (B, C, H, W), f32)
    k_in = jax.random.normal(ks[11], (B, C, H, W), f32)

    # Fold parameters ONCE (hoisted out of the forward path).
    folded = jax.tree_util.tree_map(
        lambda x: x, fold_cross_mhsa_params(params, num_heads, H * W))

    out = cross_mhsa_forward(q_in, k_in, folded, num_heads)
    out = jax.block_until_ready(out)

    ref = jax.block_until_ready(cross_mhsa_reference(q_in, k_in, params, num_heads))
    err = float(jnp.max(jnp.abs(out - ref)))
    assert out.shape == (B, C, H, W)
    assert err < 2e-2, f"max abs error too large: {err}"
    print("KERNEL_OK")
</pallas_src>

<mosaic_0001>
module attributes {stable_mosaic.version = 11 : i64} {
  func.func @_fused_cross_mhsa_kernel(%arg0: i32, %arg1: memref<1x32x64xf32, #tpu.memory_space<vmem>>, %arg2: memref<1x32x64xf32, #tpu.memory_space<vmem>>, %arg3: memref<64x96xbf16, #tpu.memory_space<vmem>>, %arg4: memref<1x96xf32, #tpu.memory_space<vmem>>, %arg5: memref<9x96xf32, #tpu.memory_space<vmem>>, %arg6: memref<1x32xf32, #tpu.memory_space<vmem>>, %arg7: memref<32x32xf32, #tpu.memory_space<vmem>>, %arg8: memref<2x16x32xbf16, #tpu.memory_space<vmem>>, %arg9: memref<1x16x128xf32, #tpu.memory_space<vmem>>) attributes {dimension_semantics = [#tpu.dimension_semantics<parallel>], iteration_bounds = array<i64: 2>, scalar_prefetch = 0 : i64, scratch_operands = 0 : i64, tpu.core_type = #tpu.core_type<tc>, window_params = [{transform_indices = @transform_0, window_bounds = array<i64: 1, 32, 64>}, {transform_indices = @transform_1, window_bounds = array<i64: 1, 32, 64>}, {pipeline_mode = #tpu.pipeline_mode<synchronous>, transform_indices = @transform_2, window_bounds = array<i64: 64, 96>}, {pipeline_mode = #tpu.pipeline_mode<synchronous>, transform_indices = @transform_3, window_bounds = array<i64: 1, 96>}, {pipeline_mode = #tpu.pipeline_mode<synchronous>, transform_indices = @transform_4, window_bounds = array<i64: 9, 96>}, {pipeline_mode = #tpu.pipeline_mode<synchronous>, transform_indices = @transform_5, window_bounds = array<i64: 1, 32>}, {pipeline_mode = #tpu.pipeline_mode<synchronous>, transform_indices = @transform_6, window_bounds = array<i64: 32, 32>}, {pipeline_mode = #tpu.pipeline_mode<synchronous>, transform_indices = @transform_7, window_bounds = array<i64: 2, 16, 32>}, {transform_indices = @transform_8, window_bounds = array<i64: 1, 16, 128>}]} {
    %c0 = arith.constant 0 : index
    %c0_0 = arith.constant 0 : index
    %c0_1 = arith.constant 0 : index
    %0 = vector.load %arg1[%c0, %c0_0, %c0_1] : memref<1x32x64xf32, #tpu.memory_space<vmem>>, vector<1x32x64xf32>
    %1 = vector.shape_cast %0 : vector<1x32x64xf32> to vector<32x64xf32>
    %c0_2 = arith.constant 0 : index
    %c0_3 = arith.constant 0 : index
    %c0_4 = arith.constant 0 : index
    %2 = vector.load %arg2[%c0_2, %c0_3, %c0_4] : memref<1x32x64xf32, #tpu.memory_space<vmem>>, vector<1x32x64xf32>
    %3 = vector.shape_cast %2 : vector<1x32x64xf32> to vector<32x64xf32>
    %cst = arith.constant dense<0.000000e+00> : vector<64xf32>
    %4 = vector.multi_reduction <add>, %1, %cst [0] : vector<32x64xf32> to vector<64xf32>
    %5 = vector.shape_cast %4 : vector<64xf32> to vector<1x64xf32>
    %cst_5 = arith.constant 3.200000e+01 : f32
    %6 = vector.broadcast %cst_5 : f32 to vector<1x64xf32>
    %7 = arith.divf %5, %6 : vector<1x64xf32>
    %8 = vector.broadcast %7 : vector<1x64xf32> to vector<32x64xf32>
    %9 = arith.subf %1, %8 : vector<32x64xf32>
    %10 = arith.mulf %9, %9 : vector<32x64xf32>
    %cst_6 = arith.constant dense<0.000000e+00> : vector<64xf32>
    %11 = vector.multi_reduction <add>, %10, %cst_6 [0] : vector<32x64xf32> to vector<64xf32>
    %12 = vector.shape_cast %11 : vector<64xf32> to vector<1x64xf32>
    %cst_7 = arith.constant 3.200000e+01 : f32
    %13 = vector.broadcast %cst_7 : f32 to vector<1x64xf32>
    %14 = arith.divf %12, %13 : vector<1x64xf32>
    %cst_8 = arith.constant 9.99999974E-6 : f32
    %15 = vector.broadcast %cst_8 : f32 to vector<1x64xf32>
    %16 = arith.addf %14, %15 : vector<1x64xf32>
    %17 = math.rsqrt %16 : vector<1x64xf32>
    %18 = vector.broadcast %17 : vector<1x64xf32> to vector<32x64xf32>
    %19 = arith.mulf %9, %18 : vector<32x64xf32>
    %cst_9 = arith.constant dense<0.000000e+00> : vector<64xf32>
    %20 = vector.multi_reduction <add>, %3, %cst_9 [0] : vector<32x64xf32> to vector<64xf32>
    %21 = vector.shape_cast %20 : vector<64xf32> to vector<1x64xf32>
    %cst_10 = arith.constant 3.200000e+01 : f32
    %22 = vector.broadcast %cst_10 : f32 to vector<1x64xf32>
    %23 = arith.divf %21, %22 : vector<1x64xf32>
    %24 = vector.broadcast %23 : vector<1x64xf32> to vector<32x64xf32>
    %25 = arith.subf %3, %24 : vector<32x64xf32>
    %26 = arith.mulf %25, %25 : vector<32x64xf32>
    %cst_11 = arith.constant dense<0.000000e+00> : vector<64xf32>
    %27 = vector.multi_reduction <add>, %26, %cst_11 [0] : vector<32x64xf32> to vector<64xf32>
    %28 = vector.shape_cast %27 : vector<64xf32> to vector<1x64xf32>
    %cst_12 = arith.constant 3.200000e+01 : f32
    %29 = vector.broadcast %cst_12 : f32 to vector<1x64xf32>
    %30 = arith.divf %28, %29 : vector<1x64xf32>
    %cst_13 = arith.constant 9.99999974E-6 : f32
    %31 = vector.broadcast %cst_13 : f32 to vector<1x64xf32>
    %32 = arith.addf %30, %31 : vector<1x64xf32>
    %33 = math.rsqrt %32 : vector<1x64xf32>
    %34 = vector.broadcast %33 : vector<1x64xf32> to vector<32x64xf32>
    %35 = arith.mulf %25, %34 : vector<32x64xf32>
    %36 = tpu.concatenate %19, %35 in 0 : vector<32x64xf32>, vector<32x64xf32> -> vector<64x64xf32>
    %37 = arith.truncf %36 : vector<64x64xf32> to vector<64x64xbf16>
    %c0_14 = arith.constant 0 : index
    %c0_15 = arith.constant 0 : index
    %38 = vector.load %arg3[%c0_14, %c0_15] : memref<64x96xbf16, #tpu.memory_space<vmem>>, vector<64x96xbf16>
    %cst_16 = arith.constant dense<0.000000e+00> : vector<64x96xf32>
    %39 = tpu.matmul %37, %38, %cst_16 {dimension_numbers = #tpu.dot_dimension_numbers<[0], [0], [1], [1], [0, 1, 1, 1], [], []>} : vector<64x64xbf16>, vector<64x96xbf16>, vector<64x96xf32> -> vector<64x96xf32>
    %c0_17 = arith.constant 0 : index
    %c0_18 = arith.constant 0 : index
    %40 = vector.load %arg4[%c0_17, %c0_18] : memref<1x96xf32, #tpu.memory_space<vmem>>, vector<1x96xf32>
    %41 = vector.broadcast %40 : vector<1x96xf32> to vector<64x96xf32>
    %42 = arith.addf %39, %41 : vector<64x96xf32>
    %43 = vector.shape_cast %42 : vector<64x96xf32> to vector<8x8x96xf32>
    %cst_19 = arith.constant 0.000000e+00 : f32
    %44 = vector.broadcast %cst_19 : f32 to vector<8x1x96xf32>
    %45 = vector.extract_strided_slice %43 {offsets = [0, 0, 0], sizes = [8, 7, 96], strides = [1, 1, 1]} : vector<8x8x96xf32> to vector<8x7x96xf32>
    %46 = tpu.concatenate %44, %45 in 1 : vector<8x1x96xf32>, vector<8x7x96xf32> -> vector<8x8x96xf32>
    %47 = vector.extract_strided_slice %43 {offsets = [0, 1, 0], sizes = [8, 7, 96], strides = [1, 1, 1]} : vector<8x8x96xf32> to vector<8x7x96xf32>
    %48 = tpu.concatenate %47, %44 in 1 : vector<8x7x96xf32>, vector<8x1x96xf32> -> vector<8x8x96xf32>
    %c0_20 = arith.constant 0 : index
    %c0_21 = arith.constant 0 : index
    %49 = vector.load %arg5[%c0_20, %c0_21] : memref<9x96xf32, #tpu.memory_space<vmem>>, vector<9x96xf32>
    %50 = vector.extract_strided_slice %49 {offsets = [0, 0], sizes = [1, 96], strides = [1, 1]} : vector<9x96xf32> to vector<1x96xf32>
    %51 = vector.extract_strided_slice %49 {offsets = [1, 0], sizes = [1, 96], strides = [1, 1]} : vector<9x96xf32> to vector<1x96xf32>
    %52 = vector.extract_strided_slice %49 {offsets = [2, 0], sizes = [1, 96], strides = [1, 1]} : vector<9x96xf32> to vector<1x96xf32>
    %53 = vector.extract_strided_slice %49 {offsets = [3, 0], sizes = [1, 96], strides = [1, 1]} : vector<9x96xf32> to vector<1x96xf32>
    %54 = vector.extract_strided_slice %49 {offsets = [4, 0], sizes = [1, 96], strides = [1, 1]} : vector<9x96xf32> to vector<1x96xf32>
    %55 = vector.extract_strided_slice %49 {offsets = [5, 0], sizes = [1, 96], strides = [1, 1]} : vector<9x96xf32> to vector<1x96xf32>
    %56 = vector.extract_strided_slice %49 {offsets = [6, 0], sizes = [1, 96], strides = [1, 1]} : vector<9x96xf32> to vector<1x96xf32>
    %57 = vector.extract_strided_slice %49 {offsets = [7, 0], sizes = [1, 96], strides = [1, 1]} : vector<9x96xf32> to vector<1x96xf32>
    %58 = vector.extract_strided_slice %49 {offsets = [8, 0], sizes = [1, 96], strides = [1, 1]} : vector<9x96xf32> to vector<1x96xf32>
    %59 = vector.shape_cast %50 : vector<1x96xf32> to vector<1x1x96xf32>
    %60 = vector.broadcast %59 : vector<1x1x96xf32> to vector<8x8x96xf32>
    %61 = arith.mulf %46, %60 : vector<8x8x96xf32>
    %62 = vector.shape_cast %51 : vector<1x96xf32> to vector<1x1x96xf32>
    %63 = vector.broadcast %62 : vector<1x1x96xf32> to vector<8x8x96xf32>
    %64 = arith.mulf %43, %63 : vector<8x8x96xf32>
    %65 = arith.addf %61, %64 : vector<8x8x96xf32>
    %66 = vector.shape_cast %52 : vector<1x96xf32> to vector<1x1x96xf32>
    %67 = vector.broadcast %66 : vector<1x1x96xf32> to vector<8x8x96xf32>
    %68 = arith.mulf %48, %67 : vector<8x8x96xf32>
    %69 = arith.addf %65, %68 : vector<8x8x96xf32>
    %70 = vector.shape_cast %53 : vector<1x96xf32> to vector<1x1x96xf32>
    %71 = vector.broadcast %70 : vector<1x1x96xf32> to vector<8x8x96xf32>
    %72 = arith.mulf %46, %71 : vector<8x8x96xf32>
    %73 = vector.shape_cast %54 : vector<1x96xf32> to vector<1x1x96xf32>
    %74 = vector.broadcast %73 : vector<1x1x96xf32> to vector<8x8x96xf32>
    %75 = arith.mulf %43, %74 : vector<8x8x96xf32>
    %76 = arith.addf %72, %75 : vector<8x8x96xf32>
    %77 = vector.shape_cast %55 : vector<1x96xf32> to vector<1x1x96xf32>
    %78 = vector.broadcast %77 : vector<1x1x96xf32> to vector<8x8x96xf32>
    %79 = arith.mulf %48, %78 : vector<8x8x96xf32>
    %80 = arith.addf %76, %79 : vector<8x8x96xf32>
    %81 = vector.shape_cast %56 : vector<1x96xf32> to vector<1x1x96xf32>
    %82 = vector.broadcast %81 : vector<1x1x96xf32> to vector<8x8x96xf32>
    %83 = arith.mulf %46, %82 : vector<8x8x96xf32>
    %84 = vector.shape_cast %57 : vector<1x96xf32> to vector<1x1x96xf32>
    %85 = vector.broadcast %84 : vector<1x1x96xf32> to vector<8x8x96xf32>
    %86 = arith.mulf %43, %85 : vector<8x8x96xf32>
    %87 = arith.addf %83, %86 : vector<8x8x96xf32>
    %88 = vector.shape_cast %58 : vector<1x96xf32> to vector<1x1x96xf32>
    %89 = vector.broadcast %88 : vector<1x1x96xf32> to vector<8x8x96xf32>
    %90 = arith.mulf %48, %89 : vector<8x8x96xf32>
    %91 = arith.addf %87, %90 : vector<8x8x96xf32>
    %cst_22 = arith.constant 0.000000e+00 : f32
    %92 = vector.broadcast %cst_22 : f32 to vector<1x8x96xf32>
    %93 = vector.extract_strided_slice %69 {offsets = [0, 0, 0], sizes = [7, 8, 96], strides = [1, 1, 1]} : vector<8x8x96xf32> to vector<7x8x96xf32>
    %94 = tpu.concatenate %92, %93 in 0 : vector<1x8x96xf32>, vector<7x8x96xf32> -> vector<8x8x96xf32>
    %95 = arith.addf %80, %94 : vector<8x8x96xf32>
    %96 = vector.extract_strided_slice %91 {offsets = [1, 0, 0], sizes = [7, 8, 96], strides = [1, 1, 1]} : vector<8x8x96xf32> to vector<7x8x96xf32>
    %97 = tpu.concatenate %96, %92 in 0 : vector<7x8x96xf32>, vector<1x8x96xf32> -> vector<8x8x96xf32>
    %98 = arith.addf %95, %97 : vector<8x8x96xf32>
    %99 = vector.shape_cast %98 : vector<8x8x96xf32> to vector<64x96xf32>
    %100 = vector.extract_strided_slice %99 {offsets = [0, 0], sizes = [64, 32], strides = [1, 1]} : vector<64x96xf32> to vector<64x32xf32>
    %101 = vector.extract_strided_slice %99 {offsets = [0, 32], sizes = [64, 32], strides = [1, 1]} : vector<64x96xf32> to vector<64x32xf32>
    %102 = vector.extract_strided_slice %99 {offsets = [0, 64], sizes = [64, 32], strides = [1, 1]} : vector<64x96xf32> to vector<64x32xf32>
    %c0_23 = arith.constant 0 : index
    %c0_24 = arith.constant 0 : index
    %103 = vector.load %arg6[%c0_23, %c0_24] : memref<1x32xf32, #tpu.memory_space<vmem>>, vector<1x32xf32>
    %104 = arith.mulf %100, %100 : vector<64x32xf32>
    %cst_25 = arith.constant dense<0.000000e+00> : vector<32xf32>
    %105 = vector.multi_reduction <add>, %104, %cst_25 [0] : vector<64x32xf32> to vector<32xf32>
    %106 = vector.shape_cast %105 : vector<32xf32> to vector<1x32xf32>
    %cst_26 = arith.constant 1.000000e-24 : f32
    %107 = vector.broadcast %cst_26 : f32 to vector<1x32xf32>
    %108 = arith.maximumf %106, %107 : vector<1x32xf32>
    %109 = math.rsqrt %108 : vector<1x32xf32>
    %110 = arith.mulf %103, %109 : vector<1x32xf32>
    %111 = arith.mulf %101, %101 : vector<64x32xf32>
    %cst_27 = arith.constant dense<0.000000e+00> : vector<32xf32>
    %112 = vector.multi_reduction <add>, %111, %cst_27 [0] : vector<64x32xf32> to vector<32xf32>
    %113 = vector.shape_cast %112 : vector<32xf32> to vector<1x32xf32>
    %cst_28 = arith.constant 1.000000e-24 : f32
    %114 = vector.broadcast %cst_28 : f32 to vector<1x32xf32>
    %115 = arith.maximumf %113, %114 : vector<1x32xf32>
    %116 = math.rsqrt %115 : vector<1x32xf32>
    %117 = vector.broadcast %110 : vector<1x32xf32> to vector<64x32xf32>
    %118 = arith.mulf %100, %117 : vector<64x32xf32>
    %119 = arith.truncf %118 : vector<64x32xf32> to vector<64x32xbf16>
    %120 = vector.broadcast %116 : vector<1x32xf32> to vector<64x32xf32>
    %121 = arith.mulf %101, %120 : vector<64x32xf32>
    %122 = arith.truncf %121 : vector<64x32xf32> to vector<64x32xbf16>
    %cst_29 = arith.constant dense<0.000000e+00> : vector<32x32xf32>
    %123 = tpu.matmul %119, %122, %cst_29 {dimension_numbers = #tpu.dot_dimension_numbers<[0], [0], [1], [1], [0, 1, 1, 1], [], []>} : vector<64x32xbf16>, vector<64x32xbf16>, vector<32x32xf32> -> vector<32x32xf32>
    %c0_30 = arith.constant 0 : index
    %c0_31 = arith.constant 0 : index
    %124 = vector.load %arg7[%c0_30, %c0_31] : memref<32x32xf32, #tpu.memory_space<vmem>>, vector<32x32xf32>
    %125 = arith.addf %123, %124 : vector<32x32xf32>
    %cst_32 = arith.constant dense<0xFF800000> : vector<32xf32>
    %126 = vector.multi_reduction <maximumf>, %125, %cst_32 [1] : vector<32x32xf32> to vector<32xf32>
    %127 = vector.shape_cast %126 : vector<32xf32> to vector<32x1xf32>
    %128 = vector.broadcast %127 : vector<32x1xf32> to vector<32x32xf32>
    %129 = arith.subf %125, %128 : vector<32x32xf32>
    %130 = math.exp %129 : vector<32x32xf32>
    %cst_33 = arith.constant dense<0.000000e+00> : vector<32xf32>
    %131 = vector.multi_reduction <add>, %130, %cst_33 [1] : vector<32x32xf32> to vector<32xf32>
    %132 = vector.shape_cast %131 : vector<32xf32> to vector<32x1xf32>
    %133 = tpu.reciprocal %132 {approx = true} : vector<32x1xf32> -> vector<32x1xf32>
    %134 = vector.broadcast %133 : vector<32x1xf32> to vector<32x32xf32>
    %135 = arith.mulf %130, %134 : vector<32x32xf32>
    %136 = arith.truncf %135 : vector<32x32xf32> to vector<32x32xbf16>
    %137 = arith.truncf %102 : vector<64x32xf32> to vector<64x32xbf16>
    %cst_34 = arith.constant dense<0.000000e+00> : vector<32x64xf32>
    %138 = tpu.matmul %136, %137, %cst_34 {dimension_numbers = #tpu.dot_dimension_numbers<[1], [1], [0], [0], [0, 0, 1, 0], [], []>} : vector<32x32xbf16>, vector<64x32xbf16>, vector<32x64xf32> -> vector<32x64xf32>
    %139 = arith.truncf %138 : vector<32x64xf32> to vector<32x64xbf16>
    %c0_35 = arith.constant 0 : index
    %c0_36 = arith.constant 0 : index
    %c0_37 = arith.constant 0 : index
    %140 = vector.load %arg8[%c0_35, %c0_36, %c0_37] : memref<2x16x32xbf16, #tpu.memory_space<vmem>>, vector<1x16x32xbf16>
    %141 = vector.shape_cast %140 : vector<1x16x32xbf16> to vector<16x32xbf16>
    %cst_38 = arith.constant dense<0.000000e+00> : vector<16x64xf32>
    %142 = tpu.matmul %141, %139, %cst_38 {dimension_numbers = #tpu.dot_dimension_numbers<[1], [0], [0], [1], [0, 0, 1, 1], [], []>} : vector<16x32xbf16>, vector<32x64xbf16>, vector<16x64xf32> -> vector<16x64xf32>
    %c1 = arith.constant 1 : index
    %c0_39 = arith.constant 0 : index
    %c0_40 = arith.constant 0 : index
    %143 = vector.load %arg8[%c1, %c0_39, %c0_40] : memref<2x16x32xbf16, #tpu.memory_space<vmem>>, vector<1x16x32xbf16>
    %144 = vector.shape_cast %143 : vector<1x16x32xbf16> to vector<16x32xbf16>
    %cst_41 = arith.constant dense<0.000000e+00> : vector<16x64xf32>
    %145 = tpu.matmul %144, %139, %cst_41 {dimension_numbers = #tpu.dot_dimension_numbers<[1], [0], [0], [1], [0, 0, 1, 1], [], []>} : vector<16x32xbf16>, vector<32x64xbf16>, vector<16x64xf32> -> vector<16x64xf32>
    %146 = tpu.concatenate %142, %145 in 1 : vector<16x64xf32>, vector<16x64xf32> -> vector<16x128xf32>
    %c0_42 = arith.constant 0 : index
    %c0_43 = arith.constant 0 : index
    %c0_44 = arith.constant 0 : index
    %147 = vector.load %arg9[%c0_42, %c0_43, %c0_44] : memref<1x16x128xf32, #tpu.memory_space<vmem>>, vector<1x16x128xf32>
    %148 = vector.shape_cast %147 : vector<1x16x128xf32> to vector<16x128xf32>
    %149 = vector.shape_cast %146 : vector<16x128xf32> to vector<1x16x128xf32>
    tpu.vector_store %arg9[%c0_42, %c0_43, %c0_44], %149 {strides = array<i32>} : memref<1x16x128xf32, #tpu.memory_space<vmem>>, vector<1x16x128xf32>,
    return
  }
  func.func @transform_0(%arg0: i32) -> (i32, i32, i32) {
    %c0_i32 = arith.constant 0 : i32
    %c0_i32_0 = arith.constant 0 : i32
    %c0_i32_1 = arith.constant 0 : i32
    return %arg0, %c0_i32, %c0_i32_0 : i32, i32, i32
  }
  func.func @transform_1(%arg0: i32) -> (i32, i32, i32) {
    %c0_i32 = arith.constant 0 : i32
    %c0_i32_0 = arith.constant 0 : i32
    %c0_i32_1 = arith.constant 0 : i32
    return %arg0, %c0_i32, %c0_i32_0 : i32, i32, i32
  }
  func.func @transform_2(%arg0: i32) -> (i32, i32) {
    %c0_i32 = arith.constant 0 : i32
    %c0_i32_0 = arith.constant 0 : i32
    %c0_i32_1 = arith.constant 0 : i32
    return %c0_i32, %c0_i32_0 : i32, i32
  }
  func.func @transform_3(%arg0: i32) -> (i32, i32) {
    %c0_i32 = arith.constant 0 : i32
    %c0_i32_0 = arith.constant 0 : i32
    %c0_i32_1 = arith.constant 0 : i32
    return %c0_i32, %c0_i32_0 : i32, i32
  }
  func.func @transform_4(%arg0: i32) -> (i32, i32) {
    %c0_i32 = arith.constant 0 : i32
    %c0_i32_0 = arith.constant 0 : i32
    %c0_i32_1 = arith.constant 0 : i32
    return %c0_i32, %c0_i32_0 : i32, i32
  }
  func.func @transform_5(%arg0: i32) -> (i32, i32) {
    %c0_i32 = arith.constant 0 : i32
    %c0_i32_0 = arith.constant 0 : i32
    %c0_i32_1 = arith.constant 0 : i32
    return %c0_i32, %c0_i32_0 : i32, i32
  }
  func.func @transform_6(%arg0: i32) -> (i32, i32) {
    %c0_i32 = arith.constant 0 : i32
    %c0_i32_0 = arith.constant 0 : i32
    %c0_i32_1 = arith.constant 0 : i32
    return %c0_i32, %c0_i32_0 : i32, i32
  }
  func.func @transform_7(%arg0: i32) -> (i32, i32, i32) {
    %c0_i32 = arith.constant 0 : i32
    %c0_i32_0 = arith.constant 0 : i32
    %c0_i32_1 = arith.constant 0 : i32
    %c0_i32_2 = arith.constant 0 : i32
    return %c0_i32, %c0_i32_0, %c0_i32_1 : i32, i32, i32
  }
  func.func @transform_8(%arg0: i32) -> (i32, i32, i32) {
    %c0_i32 = arith.constant 0 : i32
    %c0_i32_0 = arith.constant 0 : i32
    %c0_i32_1 = arith.constant 0 : i32
    return %arg0, %c0_i32, %c0_i32_0 : i32, i32, i32
  }
}

</mosaic_0001>

<bundles_post_ra>
// kernel: tpu_custom_call.1
= control target key start
LH: loop header
LB: loop body
LE: loop exit
PB: predicated region body
PF: predicated region fallthrough
CT: control target
= control target key end

     0   :  { %s2334_s0 = inlined_call_operand.hbm [shape: f32[2,32,64], index: 0, kind: input, shape index: {}]   ;;  %s2335_s1 = inlined_call_operand.hbm [shape: f32[2,32,64], index: 1, kind: input, shape index: {}]   ;;  %s2336_s2 = inlined_call_operand.hbm [shape: bf16[64,96], index: 2, kind: input, shape index: {}]   ;;  %s2337_s3 = inlined_call_operand.vmem [shape: f32[1,96], index: 3, kind: input, shape index: {}]   ;;  %s2338_s4 = inlined_call_operand.hbm [shape: f32[9,96], index: 4, kind: input, shape index: {}]   ;;  %s2339_s5 = inlined_call_operand.vmem [shape: f32[1,32], index: 5, kind: input, shape index: {}]   ;;  %s2340_s6 = inlined_call_operand.hbm [shape: f32[32,32], index: 6, kind: input, shape index: {}]   ;;  %s2341_s7 = inlined_call_operand.hbm [shape: bf16[2,16,32], index: 7, kind: input, shape index: {}]   ;;  %s2342_s8 = inlined_call_operand.hbm [shape: f32[2,16,128], index: 8, kind: output, shape index: {}]  }
   0x1   :  { %2348 = sst [smem:[#allocation22_spill]] %s2334_s0 }
   0x2   :  { %2349 = sst [smem:[#allocation23_spill]] %s2336_s2 }
   0x3   :  { %2350 = sst [smem:[#allocation24_spill]] %s2338_s4 }
   0x4   :  { %2351 = sst [smem:[#allocation25_spill]] %s2340_s6 }
   0x5   :  { %2352 = sst [smem:[#allocation26_spill]] %s2341_s7 }
   0x6   :  { %13 = vsyncpa [#allocation3], 0 }
   0x7   :  { %15 = vsyncpa [#allocation3 + $0x1], 0 }
   0x8   :  { %16 = vsyncpa [#allocation6], 0 }
   0x9   :  { %18 = vsyncpa [#allocation6 + $0x1], 0 }
   0xa   :  { %19 = vsyncpa [#allocation9], 0 }
   0xb   :  { %20 = vsyncpa [#allocation12], 0 }
   0xc   :  { %21 = vsyncpa [#allocation4], 0 }
   0xd   :  { %23 = vsyncpa [#allocation4 + $0x1], 0  ;;  %s1846_s27 = smov 0   ;;  %s1848_s28 = smov 0  }
   0xe   :  { %s1850_s29 = smov 0   ;;  %s1852_s30 = smov 0  }
   0xf LB: > { %2353 = sst [smem:[#allocation20_spill]] %s1782_s29  ;;  %s1867_s9 = sadd.s32 4294967295, %s1786_s30   ;;  %s1786_s30 = sphi %s1852_s30, %s2373_s30   ;;  %s1782_s29 = sphi %s1850_s29, %s2370_s29   ;;  %s1778_s28 = sphi %s1848_s28, %s2372_s28   ;;  %s1774_s27 = sphi %s1846_s27, %s2371_s27  }
  0x10   : > { %s1321_s10 = sadd.s32 4294967294, %s1786_s30   ;;  %p49_p0 = scmp.ne.s32.totalorder %s1778_s28, %s1774_s27 }
  0x11   : > { %p50_p1 = scmp.eq.s32.totalorder %s1867_s9, 0  ;;  %p225_p2 = scmp.eq.s32.totalorder %s1867_s9, 1 }
  0x12   : > { %p231_p3 = scmp.eq.s32.totalorder %s1321_s10, 1  ;;  %p1322_p5 = scmp.ge.s32.totalorder %s1786_s30, 1 }
  0x13   : > { %p1876_p4 = por %p50_p1, %p49_p0  ;;  %p238_p7 = scmp.lt.s32.totalorder %s1786_s30, 3 }
  0x14   : > { %p1881_p6 = por %p231_p3, %p49_p0  ;;  %s2356_s2 = sld [smem:[#allocation23_spill]] }
  0x15   : > { %p1889_p8 = pnand %p1322_p5, %p238_p7  ;;  %s1788_s17 = smov [#allocation7]  }
  0x16   : > { %s251_s18 = sshll.u32 %s1788_s17, 4  ;;  %s2359_s4 = sld [smem:[#allocation24_spill]]  ;;  %s252_s18 = int_to_ptr.vmem [resolvable:$true] %s251_s18 }
  0x17   : > { %p1416_p9 = pneg %p1889_p8  ;;  %s1789_s23 = smov 64  }
  0x18   : > { %s1790_s24 = smov 4   ;;  %s1791_s25 = smov [#allocation8]  }
  0x19   : > { %p1897_p10 = pnand %p1416_p9, %p50_p1  ;;  %s268_s26 = sshll.u32 %s1791_s25, 4  ;;  %s269_s26 = int_to_ptr.vmem [resolvable:$true] %s268_s26 }
  0x1a   : > { %s249_s15 = sshll.u32 %s2356_s2, 4  ;;  %s2343_s10 = smov 128   ;;  %s250_s15 = int_to_ptr.hbm [resolvable:$true] %s249_s15 }
  0x1b   : > { %1419 = dma.hbm_to_vmem [thread:$0]  (!%p1897_p10), %s250_s15, 512, %s252_s18, [#allocation6], %s1789_s23, %s1789_s23, %s1790_s24  }
  0x1c   : > { %s266_s22 = sshll.u32 %s2359_s4, 4  ;;  %s2345_s13 = smov 8   ;;  %s267_s22 = int_to_ptr.hbm [resolvable:$true] %s266_s22 }
  0x1d   : > { %1422 = dma.hbm_to_vmem [thread:$0]  (!%p1897_p10), %s267_s22, 256, %s269_s26, [#allocation9], %s2343_s10, %s2343_s10, %s2345_s13  }
  0x1e   : > { %s2360_s6 = sld [smem:[#allocation25_spill]]  ;;  %s1794_s18 = smov [#allocation10]  }
  0x1f   : > { %s285_s20 = sshll.u32 %s1794_s18, 4  ;;  %s2361_s7 = sld [smem:[#allocation26_spill]]  ;;  %s286_s20 = int_to_ptr.vmem [resolvable:$true] %s285_s20 }
  0x20   : > { %s1795_s22 = smov [#allocation11]   ;;  %s1926_s14 = sadd.s32 1, %s1786_s30  }
  0x21   : > { %s299_s26 = sshll.u32 %s1795_s22, 4  ;;  %s36_s17 = sadd.s32 1, %s1782_s29  ;;  %s300_s26 = int_to_ptr.vmem [resolvable:$true] %s299_s26 }
  0x22   : > { %s33_s18 = ssub.s32 %s1786_s30, %s1926_s14  ;;  %p43_p12 = scmp.ne.s32.totalorder %s1782_s29, %s1778_s28 }
  0x23   : > { %p34_p13 = scmp.eq.s32.totalorder %s33_s18, 0  ;;  %p44_p0 = scmp.eq.s32.totalorder %s1786_s30, 0 }
  0x24   : > { %s283_s15 = sshll.u32 %s2360_s6, 4  ;;  %p1936_p3 = por %p225_p2, %p43_p12  ;;  %s284_s15 = int_to_ptr.hbm [resolvable:$true] %s283_s15 }
  0x25   : > { %s297_s2 = sshll.u32 %s2361_s7, 4  ;;  %p1444_p5 = scmp.lt.s32.totalorder %s1786_s30, 2  ;;  %s298_s2 = int_to_ptr.hbm [resolvable:$true] %s297_s2 }
  0x26   : > { %1425 = dma.hbm_to_vmem [thread:$0]  (!%p1897_p10), %s284_s15, 512, %s286_s20, [#allocation9], %s2343_s10, %s2343_s10, %s2345_s13  }
  0x27   : > { %1428 = dma.hbm_to_vmem [thread:$0]  (!%p1897_p10), %s298_s2, 256, %s300_s26, [#allocation12], %s1789_s23, %s1789_s23, %s1790_s24  }
  0x28   : > { %s1942_s15 = scalar_select %p34_p13, %s1782_s29, %s36_s17  }
  0x29   : > { %p45_p7 = por %p44_p0, %p43_p12  ;;  %s313_s20 = sand.u32 1, %s1782_s29  }
  0x2a   : > { %2363 = sst [smem:[#allocation21_spill]] %s1942_s15  ;;  %s1945_s19 = sshll.u32 %s313_s20, 5 }
  0x2b   : > { %s1381_s2 = sshll.u32 %s1786_s30, 5  ;;  %s2364_s0 = sld [smem:[#allocation22_spill]] }
  0x2c   : > { %s317_s22 = scalar_lea.vmem [#allocation2], %s1945_s19  ;;  %p1952_p2 = pnand %p1444_p5, %p45_p7 }
  0x2d   : > { %s325_s26 = sshll.u32 %s317_s22, 4  ;;  %s344_s4 = scalar_lea.hbm %s2335_s1, %s1381_s2  ;;  %s326_s26 = int_to_ptr.vmem [resolvable:$true] %s325_s26 }
  0x2e   : > { %s345_s6 = sshll.u32 %s344_s4, 4  ;;  %s314_s7 = scalar_lea.sflag [#allocation3], %s313_s20  ;;  %s346_s6 = int_to_ptr.hbm [resolvable:$true] %s345_s6 }
  0x2f   : > { %p1648_p10 = pneg %p1952_p2 }
  0x31   : > { %s322_s25 = scalar_lea.hbm %s2364_s0, %s1381_s2  ;;  %s1651_s22 = scalar_lea.hbm %s2364_s0, 64 }
  0x32   : > { %s323_s18 = sshll.u32 %s322_s25, 4  ;;  %s324_s18 = int_to_ptr.hbm [resolvable:$true] %s323_s18 }
  0x33   : > { %s1644_s15 = sshra.s32 %s324_s18, 4  ;;  %s1645_s15 = int_to_ptr.hbm [resolvable:$true] %s1644_s15 }
  0x34   : > { %s1646_s23 = scalar_lea.hbm %s1645_s15, 32  ;;  %p1652_p0 = scmp.lt.s32.totalorder %s1645_s15, %s2364_s0 }
  0x35   : > { %p1647_p9 = scmp.ne.s32.totalorder %s1645_s15, %s1646_s23  ;;  %p1653_p5 = scmp.lt.s32.totalorder %s1651_s22, %s1646_s23 }
  0x37   : > { %p1649_p12 = pnand %p1648_p10, %p1647_p9  ;;  %p1654_p7 = por %p1653_p5, %p1652_p0 }
  0x39   : > { %p1650_p13 = pneg %p1649_p12 }
  0x3b   : > { %p1655_p11 = pnand %p1654_p7, %p1650_p13 }
  0x3d   : > { %1658 = shalt.err (!%p1655_p11)
}
  0x3e   : > { %s2366_s4 = smov 8   ;;  %s2367_s20 = smov 128  }
  0x3f   : > { %1432 = dma.hbm_to_vmem [thread:$0]  (!%p1952_p2), %s324_s18, 512, %s326_s26, %s314_s7, %s2367_s20, %s2367_s20, %s2366_s4  }
  0x40   : > { %s339_s2 = scalar_lea.vmem [#allocation5], %s1945_s19  ;;  %s335_s25 = sand.u32 1, %s1786_s30  }
  0x41   : > { %s347_s24 = sshll.u32 %s339_s2, 4  ;;  %s336_s13 = scalar_lea.sflag [#allocation6], %s335_s25  ;;  %s348_s24 = int_to_ptr.vmem [resolvable:$true] %s347_s24 }
  0x42   : > { %s1674_s15 = sshra.s32 %s346_s6, 4  ;;  %s1681_s0 = scalar_lea.hbm %s2335_s1, 64  ;;  %s1675_s15 = int_to_ptr.hbm [resolvable:$true] %s1674_s15 }
  0x43   : > { %s1676_s23 = scalar_lea.hbm %s1675_s15, 32  ;;  %p1682_p13 = scmp.lt.s32.totalorder %s1675_s15, %s2335_s1 }
  0x44   : > { %p1677_p9 = scmp.ne.s32.totalorder %s1675_s15, %s1676_s23  ;;  %p1683_p0 = scmp.lt.s32.totalorder %s1681_s0, %s1676_s23 }
  0x46   : > { %p1679_p11 = pnand %p1677_p9, %p1648_p10  ;;  %p1684_p5 = por %p1683_p0, %p1682_p13 }
  0x48   : > { %p1680_p12 = pneg %p1679_p11 }
  0x4a   : > { %p1685_p7 = pnand %p1684_p5, %p1680_p12 }
  0x4c   : > { %1688 = shalt.err (!%p1685_p7)
}
  0x4d   : > { %1435 = dma.hbm_to_vmem [thread:$0]  (!%p1952_p2), %s346_s6, 512, %s348_s24, %s336_s13, %s2367_s20, %s2367_s20, %s2366_s4  }
  0x4e   : > { %359 = sbr.rel (%p1889_p8) target bundleno = 1713 (0x6b1), region = 52  ;;  %s1994_s19 = sand.u32 (!%p1889_p8), 1, %s1778_s28  }
  0x4f   : > { %s1335_s29 = sshll.u32 (!%p1889_p8), %s1994_s19, 5  ;;  %s362_s0 = scalar_lea.sflag (!%p1889_p8), [#allocation3], %s1994_s19 }
  0x50   : > { %s365_s26 = scalar_lea.vmem (!%p1889_p8), [#allocation2], %s1335_s29 }
  0x53   : > { %1749 = dma.done.wait (%p1876_p4), %s362_s0, 512  }
  0x54   : > { %1751 = vsyncadd (%p1876_p4), %s362_s0, 4294966784  ;;  %s371_s6 = sand.u32 1, %s1867_s9   ;;  %s375_s16 = scalar_lea.vmem [#allocation5], %s1335_s29 }
  0x55   : > { %s372_s10 = scalar_lea.sflag [#allocation6], %s371_s6 }
  0x56   : > { %1753 = dma.done.wait (%p1876_p4), %s372_s10, 512  }
  0x57   : > { %1755 = vsyncadd (%p1876_p4), %s372_s10, 4294966784 }
  0x58   : > { %1757 = dma.done.wait (%p50_p1), [#allocation6], 512  }
  0x59   : > { %1759 = vsyncadd (%p50_p1), [#allocation6], 4294966784 }
  0x5a   : > { %1761 = dma.done.wait (%p50_p1), [#allocation9], 768  }
  0x5b   : > { %1763 = vsyncadd (%p50_p1), [#allocation9], 4294966528 }
  0x5c   : > { %1765 = dma.done.wait (%p50_p1), [#allocation12], 256  }
  0x5d   : > { %1767 = vsyncadd (%p50_p1), [#allocation12], 4294967040  ;;  %v1796_v0 = vmov 32.0   ;;  %vm443_vm0 = vcmask 523264   ;;  %v435_v2 = vld [vmem:[%s365_s26] sm:$0xff]  ;;  %v436_v3 = vld [vmem:[%s365_s26 + $0x8] sm:$0xff] }
  0x5e   : > { %1498 = vrcp.f32 %v1796_v0  ;;  %v437_v4 = vld [vmem:[%s365_s26 + $0x10] sm:$0xff]  ;;  %v438_v5 = vld [vmem:[%s365_s26 + $0x18] sm:$0xff]  ;;  %v444_v6 = vsel %vm443_vm0, %v435_v2, 0.0  ;;  %v445_v7 = vsel %vm443_vm0, %v436_v3, 0.0  ;;  %v439_v10 = vld [vmem:[%s375_s16] sm:$0xff]  ;;  %vm674_vm8 = vcmask 1040384  }
  0x5f   : > { %v447_v8 = vsel %vm443_vm0, %v437_v4, 0.0  ;;  %v446_v11 = vadd.f32 %v445_v7, %v444_v6  ;;  %v440_v12 = vld [vmem:[%s375_s16 + $0x8] sm:$0xff]  ;;  %v441_v13 = vld [vmem:[%s375_s16 + $0x10] sm:$0xff]  ;;  %v502_v14 = vsel %vm443_vm0, %v439_v10, 0.0  ;;  %v449_v15 = vsel %vm443_vm0, %v438_v5, 0.0  ;;  %v442_v19 = vld [vmem:[%s375_s16 + $0x18] sm:$0xff] }
  0x60   : > { %v503_v16 = vsel %vm443_vm0, %v440_v12, 0.0  ;;  %v505_v17 = vsel %vm443_vm0, %v441_v13, 0.0  ;;  %v507_v22 = vsel %vm443_vm0, %v442_v19, 0.0  ;;  %vm699_vm9 = vcmask 1046528   ;;  %s1797_s2 = smov 96   ;;  %s1798_s24 = smov 64  }
  0x61   : > { %v448_v18 = vadd.f32 %v447_v8, %v446_v11  ;;  %v504_v20 = vadd.f32 %v503_v16, %v502_v14  ;;  %vm854_vm10 = vcmask 261120   ;;  %vm888_vm11 = vcmask 523520   ;;  %s1341_s25 = sshll.u32 %s1994_s19, 4  ;;  %s1389_s15 = sshll.u32 %s1867_s9, 4 }
  0x62   : > { %s433_s13 = scalar_lea.vmem [#allocation13], %s1341_s25  ;;  %s1183_s17 = scalar_lea.hbm %s2342_s8, %s1389_s15 }
  0x63   : > { %v450_v23 = vadd.f32 %v449_v15, %v448_v18  ;;  %v506_v24 = vadd.f32 %v505_v17, %v504_v20  ;;  %s1184_s7 = sshll.u32 %s433_s13, 4  ;;  %s1186_s29 = sshll.u32 %s1183_s17, 4  ;;  %s1185_s7 = int_to_ptr.vmem [resolvable:$true] %s1184_s7  ;;  %s1187_s29 = int_to_ptr.hbm [resolvable:$true] %s1186_s29 }
  0x64   : > { %v1499_v1 = vpop.eup %1498  ;;  %s1172_s0 = scalar_lea.sflag [#allocation4], %s1994_s19  ;;  %s1718_s26 = sshra.s32 %s1187_s29, 4  ;;  %s1719_s26 = int_to_ptr.hbm [resolvable:$true] %s1718_s26 }
  0x65   : > { %v458_v9 = vmul.f32 32.0, %v1499_v1  ;;  %v451_v25 = vrot.slane %v450_v23, 4  ;;  %v508_v26 = vadd.f32 %v507_v22, %v506_v24  ;;  %vm462_vm1 = vweird.f32 %v1499_v1  ;;  %s1720_s6 = scalar_lea.hbm %s1719_s26, 16  ;;  %s1724_s16 = scalar_lea.hbm %s2342_s8, 32 }
  0x66   : > { %p1721_p1 = scmp.ne.s32.totalorder %s1719_s26, %s1720_s6  ;;  %p1725_p2 = scmp.lt.s32.totalorder %s1719_s26, %s2342_s8 }
  0x67   : > { %v459_v21 = vsub.f32 1.0, %v458_v9  ;;  %v452_v28 = vadd.f32 %v451_v25, %v450_v23  ;;  %v509_v29 = vrot.slane %v508_v26, 4  ;;  %p1726_p10 = scmp.lt.s32.totalorder %s1724_s16, %s1720_s6 }
  0x68   : > { %p1722_p4 = pnand %p1721_p1, %p1936_p3 }
  0x69   : > { %v460_v27 = vmul.f32 %v1499_v1, %v459_v21  ;;  %v453_v30 = vrot.slane %v452_v28, 2  ;;  %v510_v31 = vadd.f32 %v509_v29, %v508_v26  ;;  %p1727_p9 = por %p1726_p10, %p1725_p2 }
  0x6a   : > { %p1723_p8 = pneg %p1722_p4 }
  0x6b   : > { %v461_v32 = vadd.f32 %v1499_v1, %v460_v27  ;;  %v454_v33 = vadd.f32 %v453_v30, %v452_v28  ;;  %v511_v34 = vrot.slane %v510_v31, 2 }
  0x6c   : > { %p1728_p11 = pnand %p1727_p9, %p1723_p8 }
  0x6d   : > { %v455_v35 = vrot.slane %v454_v33, 1  ;;  %v512_v36 = vadd.f32 %v511_v34, %v510_v31  ;;  %v463_v37 = vsel %vm462_vm1, %v1499_v1, %v461_v32 }
  0x6f   : > { %v456_v38 = vadd.f32 %v455_v35, %v454_v33  ;;  %v513_v39 = vrot.slane %v512_v36, 1 }
  0x71   : > { %v464_v40 = vmul.f32 %v463_v37, %v456_v38  ;;  %v514_v41 = vadd.f32 %v513_v39, %v512_v36 }
  0x73   : > { %v465_v42 = vsub.f32 %v435_v2, %v464_v40  ;;  %v466_v43 = vsub.f32 %v436_v3, %v464_v40  ;;  %v2027_v44 = vsub.f32 %v437_v4, %v464_v40  ;;  %v2029_v45 = vsub.f32 %v438_v5, %v464_v40 }
  0x74   : > { %v515_v46 = vmul.f32 %v514_v41, %v463_v37 }
  0x75   : > { %v469_v47 = vmul.f32 %v465_v42, %v465_v42  ;;  %v470_v48 = vmul.f32 %v466_v43, %v466_v43  ;;  %v471_v49 = vmul.f32 %v2027_v44, %v2027_v44  ;;  %v472_v50 = vmul.f32 %v2029_v45, %v2029_v45 }
  0x76   : > { %v2035_v51 = vsub.f32 %v439_v10, %v515_v46  ;;  %v2037_v52 = vsub.f32 %v440_v12, %v515_v46  ;;  %v2039_v53 = vsub.f32 %v441_v13, %v515_v46  ;;  %v2044_v58 = vsub.f32 %v442_v19, %v515_v46 }
  0x77   : > { %v473_v54 = vsel %vm443_vm0, %v469_v47, 0.0  ;;  %v474_v55 = vsel %vm443_vm0, %v470_v48, 0.0  ;;  %v476_v56 = vsel %vm443_vm0, %v471_v49, 0.0  ;;  %v478_v61 = vsel %vm443_vm0, %v472_v50, 0.0  ;;  %v1386_v47 = vld [vmem:[#allocation7 + $0x18] sm:$0xff]  ;;  %v1384_v49 = vld [vmem:[#allocation7 + $0x8] sm:$0xff] }
  0x78   : > { %v475_v57 = vadd.f32 %v474_v55, %v473_v54  ;;  %v520_v59 = vmul.f32 %v2035_v51, %v2035_v51  ;;  %v521_v60 = vmul.f32 %v2037_v52, %v2037_v52  ;;  %v522_v62 = vmul.f32 %v2039_v53, %v2039_v53  ;;  %625 = vmatpush.bf16.msra.mxu0 %v1386_v47  ;;  %v1383_v50 = vld [vmem:[#allocation7] sm:$0xff] }
  0x79   : > { %v523_v0 = vmul.f32 %v2044_v58, %v2044_v58  ;;  %1390 = vmatpush.bf16.msra.mxu3 %v1386_v47 }
  0x7a   : > { %v477_v63 = vadd.f32 %v476_v56, %v475_v57  ;;  %v524_v1 = vsel %vm443_vm0, %v520_v59, 0.0  ;;  %v525_v2 = vsel %vm443_vm0, %v521_v60, 0.0  ;;  %v527_v4 = vsel %vm443_vm0, %v522_v62, 0.0 }
  0x7b   : > { %v526_v3 = vadd.f32 %v525_v2, %v524_v1  ;;  %v529_v6 = vsel %vm443_vm0, %v523_v0, 0.0  ;;  %v708_v2 = vld [vmem:[#allocation8] sm:$0xff] }
  0x7c   : > { %v479_v5 = vadd.f32 %v478_v61, %v477_v63 }
  0x7d   : > { %v528_v7 = vadd.f32 %v527_v4, %v526_v3 }
  0x7e   : > { %v480_v8 = vrot.slane %v479_v5, 4 }
  0x7f   : > { %v530_v9 = vadd.f32 %v529_v6, %v528_v7  ;;  %v2079_v6 = vperm.slane %v708_v2, 1  ;;  %v2081_v7 = vperm.slane %v708_v2, 4 }
  0x80   : > { %v481_v10 = vadd.f32 %v480_v8, %v479_v5  ;;  %v2077_v5 = vperm.slane %v708_v2, 0 }
  0x81   : > { %v531_v11 = vrot.slane %v530_v9, 4 }
  0x82   : > { %v482_v12 = vrot.slane %v481_v10, 2 }
  0x83   : > { %v532_v13 = vadd.f32 %v531_v11, %v530_v9 }
  0x84   : > { %v483_v14 = vadd.f32 %v482_v12, %v481_v10  ;;  %v2084_v10 = vperm.slane %v708_v2, 3 }
  0x85   : > { %v533_v15 = vrot.slane %v532_v13, 2 }
  0x86   : > { %v484_v16 = vrot.slane %v483_v14, 1 }
  0x87   : > { %v534_v18 = vadd.f32 %v533_v15, %v532_v13  ;;  %v2087_v13 = vperm.slane %v708_v2, 6 }
  0x88   : > { %v485_v17 = vadd.f32 %v484_v16, %v483_v14  ;;  %v2089_v14 = vperm.slane %v708_v2, 7  ;;  %v2091_v16 = vperm.slane %v708_v2, 2 }
  0x89   : > { %v535_v21 = vrot.slane %v534_v18, 1 }
  0x8a   : > { %v486_v19 = vmul.f32 %v485_v17, %v463_v37 }
  0x8b   : > { %v536_v22 = vadd.f32 %v535_v21, %v534_v18  ;;  %v2096_v21 = vperm.slane %v708_v2, 5 }
  0x8c   : > { %v487_v20 = vadd.f32 1e-05, %v486_v19 }
  0x8d   : > { %v537_v24 = vmul.f32 %v536_v22, %v463_v37 }
  0x8e   : > { %1500 = vrsqrt.f32 %v487_v20  ;;  %vm494_vm2 = vweird.f32 %v487_v20 }
  0x8f   : > { %v538_v27 = vadd.f32 1e-05, %v537_v24 }
  0x91   : > { %1502 = vrsqrt.f32 %v538_v27  ;;  %vm545_vm5 = vweird.f32 %v538_v27 }
  0x94   : > { %v1501_v23 = vpop.eup %1500 }
  0x95   : > { %v489_v25 = vmul.f32 %v1501_v23, %v487_v20  ;;  %vm495_vm3 = vweird.f32 %v1501_v23 }
  0x96   : > { %vm496_vm4 = vmor %vm494_vm2, %vm495_vm3 }
  0x97   : > { %v490_v26 = vmul.f32 %v1501_v23, %v489_v25  ;;  %v1503_v34 = vpop.eup %1502 }
  0x98   : > { %v540_v36 = vmul.f32 %v1503_v34, %v538_v27  ;;  %vm546_vm6 = vweird.f32 %v1503_v34 }
  0x99   : > { %v491_v28 = vmul.f32 0.5, %v490_v26  ;;  %vm547_vm7 = vmor %vm545_vm5, %vm546_vm6 }
  0x9a   : > { %v541_v38 = vmul.f32 %v1503_v34, %v540_v36 }
  0x9b   : > { %v492_v29 = vsub.f32 1.5, %v491_v28 }
  0x9c   : > { %v542_v40 = vmul.f32 0.5, %v541_v38 }
  0x9d   : > { %v493_v30 = vmul.f32 %v1501_v23, %v492_v29  ;;  %v2105_v29 = vld [vmem:[#allocation8 + $0x8] ss:$0 sm:$0xff] }
  0x9e   : > { %v543_v46 = vsub.f32 1.5, %v542_v40 }
  0x9f   : > { %v497_v31 = vsel %vm496_vm4, %v1501_v23, %v493_v30 }
  0xa0   : > { %v498_v32 = vmul.f32 %v497_v31, %v465_v42  ;;  %v499_v33 = vmul.f32 %v497_v31, %v466_v43  ;;  %v500_v37 = vmul.f32 %v497_v31, %v2027_v44  ;;  %v501_v39 = vmul.f32 %v497_v31, %v2029_v45  ;;  %v1385_v42 = vld [vmem:[#allocation7 + $0x10] sm:$0xff] }
  0xa1   : > { %v544_v48 = vmul.f32 %v1503_v34, %v543_v46  ;;  %626 = vmatpush.bf16.msra.mxu0 %v1385_v42  ;;  %1391 = vmatpush.bf16.msra.mxu3 %v1385_v42 }
  0xa2   : > { %v553_v35 = vpack.c.bf16 %v499_v33, %v498_v32  ;;  %v554_v41 = vpack.c.bf16 %v501_v39, %v500_v37 }
  0xa3   : > { %v548_v43 = vsel %vm547_vm7, %v1503_v34, %v544_v48 }
  0xa4   : > { %569 = vxpose.xlu0.c.b16.start [1/4] (short) (narrow) %v553_v35, 64  ;;  %v549_v44 = vmul.f32 %v548_v43, %v2035_v51  ;;  %v550_v45 = vmul.f32 %v548_v43, %v2037_v52  ;;  %v551_v55 = vmul.f32 %v548_v43, %v2039_v53  ;;  %v552_v56 = vmul.f32 %v548_v43, %v2044_v58  ;;  %v2072_v53 = vld [vmem:[%s2337_s3] ss:$0 sm:$0xff] }
  0xa5   : > { %627 = vmatpush.bf16.msra.mxu0 %v1384_v49  ;;  %1392 = vmatpush.bf16.msra.mxu3 %v1384_v49 }
  0xa6   : > { %v555_v54 = vpack.c.bf16 %v550_v45, %v549_v44  ;;  %v556_v57 = vpack.c.bf16 %v552_v56, %v551_v55 }
  0xa9   : > { %628 = vmatpush.bf16.msra.mxu0 %v1383_v50  ;;  %1393 = vmatpush.bf16.msra.mxu3 %v1383_v50 }
  0xb4   : > { %570 = vxpose.xlu0.c.b16.cont [2/4] (short) (narrow) %v554_v41, 64 }
  0xc4   : > { %571 = vxpose.xlu0.c.b16.cont [3/4] (short) (narrow) %v555_v54, 64 }
  0xd4   : > { %572 = vxpose.xlu0.c.b16.end [4/4] (short) (narrow) %v556_v57, 64 }
 0x150   : > { %v577_v59 = vpop.trf.xlu0 }
 0x151   : > { %1358 = vmatmul.msk.bf16.vlgmr.msra.gmra.mxu0 %vm443_vm0, %v577_v59 }
 0x160   : > { %v578_v60 = vpop.trf.xlu0 }
 0x161   : > { %1359 = vmatmul.msk.bf16.gmra.mxu0 %vm443_vm0, %v578_v60 }
 0x170   : > { %v579_v51 = vpop.trf.xlu0 }
 0x171   : > { %1360 = vmatmul.msk.bf16.gmra.mxu0 %vm443_vm0, %v579_v51 }
 0x180   : > { %v580_v52 = vpop.trf.xlu0 }
 0x181   : > { %1361 = vmatmul.msk.bf16.vlgmr.msra.gmra.mxu3 %vm443_vm0, %v580_v52 }
 0x1ce   : > { %v630_v61 = vpop.f32.mrf.mxu0 }
 0x1cf   : > { %v631_v58 = vadd.f32 %v2072_v53, %v630_v61 }
 0x1d1   : > { %v658_v1 = vrot.slane %v631_v58, 7  ;;  %v683_v9 = vrot.slane %v631_v58, 1  ;;  %v719_v19 = vmul.f32 %v2079_v6, %v631_v58  ;;  %v758_v20 = vmul.f32 %v2081_v7, %v631_v58 }
 0x1d3   : > { %v675_v8 = vsel %vm674_vm8, 0.0, %v658_v1  ;;  %v700_v22 = vsel %vm699_vm9, %v683_v9, 0.0 }
 0x1d4   : > { %v711_v18 = vmul.f32 %v2077_v5, %v675_v8  ;;  %v749_v23 = vmul.f32 %v2084_v10, %v675_v8  ;;  %v734_v33 = vmul.f32 %v2091_v16, %v700_v22  ;;  %v775_v34 = vmul.f32 %v2096_v21, %v700_v22 }
 0x1d6   : > { %v632_v62 = vpop.f32.mrf.mxu0  ;;  %v726_v32 = vadd.f32 %v719_v19, %v711_v18  ;;  %v766_v35 = vadd.f32 %v758_v20, %v749_v23 }
 0x1d7   : > { %v633_v63 = vadd.f32 %v2072_v53, %v632_v62 }
 0x1d8   : > { %v741_v49 = vadd.f32 %v734_v33, %v726_v32  ;;  %v783_v54 = vadd.f32 %v775_v34, %v766_v35 }
 0x1d9   : > { %v659_v3 = vrot.slane %v633_v63, 7  ;;  %v684_v12 = vrot.slane %v633_v63, 1  ;;  %v759_v25 = vmul.f32 %v2081_v7, %v633_v63  ;;  %v800_v28 = vmul.f32 %v2089_v14, %v633_v63 }
 0x1da   : > { %v720_v43 = vmul.f32 %v2079_v6, %v633_v63 }
 0x1db   : > { %v676_v11 = vsel %vm674_vm8, 0.0, %v659_v3  ;;  %v701_v26 = vsel %vm699_vm9, %v684_v12, 0.0 }
 0x1dc   : > { %v750_v24 = vmul.f32 %v2084_v10, %v676_v11  ;;  %v792_v27 = vmul.f32 %v2087_v13, %v676_v11  ;;  %v776_v38 = vmul.f32 %v2096_v21, %v701_v26  ;;  %v815_v40 = vmul.f32 %v2105_v29, %v701_v26 }
 0x1dd   : > { %v712_v42 = vmul.f32 %v2077_v5, %v676_v11  ;;  %v735_v52 = vmul.f32 %v2091_v16, %v701_v26 }
 0x1de   : > { %v635_v0 = vpop.f32.mrf.mxu0  ;;  %v767_v36 = vadd.f32 %v759_v25, %v750_v24  ;;  %v807_v39 = vadd.f32 %v800_v28, %v792_v27 }
 0x1df   : > { %v636_v4 = vadd.f32 %v2072_v53, %v635_v0  ;;  %v727_v51 = vadd.f32 %v720_v43, %v712_v42 }
 0x1e0   : > { %v784_v44 = vadd.f32 %v776_v38, %v767_v36  ;;  %v822_v55 = vadd.f32 %v815_v40, %v807_v39 }
 0x1e1   : > { %v660_v17 = vrot.slane %v636_v4, 7  ;;  %v685_v31 = vrot.slane %v636_v4, 1  ;;  %v801_v46 = vmul.f32 %v2089_v14, %v636_v4  ;;  %v760_v60 = vmul.f32 %v2081_v7, %v636_v4 }
 0x1e2   : > { %v721_v61 = vmul.f32 %v2079_v6, %v636_v4  ;;  %v830_v62 = vadd.f32 %v784_v44, %v741_v49  ;;  %v2128_v1 = vadd.f32 %v822_v55, %v783_v54  ;;  %v742_v24 = vadd.f32 %v735_v52, %v727_v51 }
 0x1e3   : > { %v677_v30 = vsel %vm674_vm8, 0.0, %v660_v17  ;;  %v702_v48 = vsel %vm699_vm9, %v685_v31, 0.0 }
 0x1e4   : > { %v793_v41 = vmul.f32 %v2087_v13, %v677_v30  ;;  %v816_v57 = vmul.f32 %v2105_v29, %v702_v48  ;;  %v751_v59 = vmul.f32 %v2084_v10, %v677_v30  ;;  %v713_v2 = vmul.f32 %v2077_v5, %v677_v30 }
 0x1e5   : > { %v777_v3 = vmul.f32 %v2096_v21, %v702_v48  ;;  %v846_v25 = vmul.f32 %v2128_v1, %v2128_v1  ;;  %v736_v26 = vmul.f32 %v2091_v16, %v702_v48 }
 0x1e6   : > { %v637_v15 = vpop.f32.mrf.mxu0  ;;  %v808_v56 = vadd.f32 %v801_v46, %v793_v41  ;;  %v768_v11 = vadd.f32 %v760_v60, %v751_v59  ;;  %v728_v28 = vadd.f32 %v721_v61, %v713_v2 }
 0x1e7   : > { %v638_v37 = vadd.f32 %v2072_v53, %v637_v15  ;;  %v855_v42 = vsel %vm854_vm10, %v846_v25, 0.0 }
 0x1e8   : > { %v823_v8 = vadd.f32 %v816_v57, %v808_v56  ;;  %v785_v30 = vadd.f32 %v777_v3, %v768_v11  ;;  %v743_v43 = vadd.f32 %v736_v26, %v728_v28 }
 0x1e9   : > { %v661_v45 = vrot.slane %v638_v37, 7  ;;  %v686_v63 = vrot.slane %v638_v37, 1  ;;  %v761_v15 = vmul.f32 %v2081_v7, %v638_v37  ;;  %v802_v18 = vmul.f32 %v2089_v14, %v638_v37 }
 0x1ea   : > { %v2146_v27 = vadd.f32 %v830_v62, %v823_v8  ;;  %v722_v48 = vmul.f32 %v2079_v6, %v638_v37  ;;  %v831_v57 = vadd.f32 %v785_v30, %v742_v24 }
 0x1eb   : > { %v678_v58 = vsel %vm674_vm8, 0.0, %v661_v45  ;;  %v703_v19 = vsel %vm699_vm9, %v686_v63, 0.0 }
 0x1ec   : > { %v752_v12 = vmul.f32 %v2084_v10, %v678_v58  ;;  %v794_v17 = vmul.f32 %v2087_v13, %v678_v58  ;;  %v778_v32 = vmul.f32 %v2096_v21, %v703_v19  ;;  %v817_v34 = vmul.f32 %v2105_v29, %v703_v19 }
 0x1ed   : > { %v847_v46 = vmul.f32 %v2146_v27, %v2146_v27  ;;  %v737_v59 = vmul.f32 %v2091_v16, %v703_v19 }
 0x1ee   : > { %v640_v47 = vpop.f32.mrf.mxu0  ;;  %v769_v31 = vadd.f32 %v761_v15, %v752_v12  ;;  %v809_v33 = vadd.f32 %v802_v18, %v794_v17  ;;  %v889_v15 = vsel %vm888_vm11, %v846_v25, 0.0 }
 0x1ef   : > { %v2119_v50 = vadd.f32 %v2072_v53, %v640_v47  ;;  %v714_v47 = vmul.f32 %v2077_v5, %v678_v58  ;;  %v856_v37 = vsel %vm854_vm10, %v847_v46, 0.0  ;;  %v890_v17 = vsel %vm888_vm11, %v847_v46, 0.0 }
 0x1f0   : > { %v786_v49 = vadd.f32 %v778_v32, %v769_v31  ;;  %v824_v45 = vadd.f32 %v817_v34, %v809_v33 }
 0x1f1   : > { %v662_v0 = vrot.slane %v2119_v50, 7  ;;  %v687_v22 = vrot.slane %v2119_v50, 1  ;;  %v803_v36 = vmul.f32 %v2089_v14, %v2119_v50  ;;  %v762_v40 = vmul.f32 %v2081_v7, %v2119_v50 }
 0x1f2   : > { %v729_v52 = vadd.f32 %v722_v48, %v714_v47  ;;  %v832_v58 = vadd.f32 %v786_v49, %v743_v43  ;;  %v2176_v3 = vadd.f32 %v831_v57, %v824_v45  ;;  %v891_v48 = vadd.f32 %v890_v17, %v889_v15 }
 0x1f3   : > { %v679_v20 = vsel %vm674_vm8, 0.0, %v662_v0  ;;  %v704_v38 = vsel %vm699_vm9, %v687_v22, 0.0  ;;  %v723_v0 = vmul.f32 %v2079_v6, %v2119_v50 }
 0x1f4   : > { %v795_v35 = vmul.f32 %v2087_v13, %v679_v20  ;;  %v753_v39 = vmul.f32 %v2084_v10, %v679_v20  ;;  %v818_v55 = vmul.f32 %v2105_v29, %v704_v38  ;;  %v779_v51 = vmul.f32 %v2096_v21, %v704_v38 }
 0x1f5   : > { %v715_v63 = vmul.f32 %v2077_v5, %v679_v20  ;;  %v857_v20 = vadd.f32 %v856_v37, %v855_v42  ;;  %v744_v22 = vadd.f32 %v737_v59, %v729_v52  ;;  %v738_v26 = vmul.f32 %v2091_v16, %v704_v38 }
 0x1f6   : > { %v642_v9 = vpop.f32.mrf.mxu0  ;;  %v810_v54 = vadd.f32 %v803_v36, %v795_v35  ;;  %v770_v60 = vadd.f32 %v762_v40, %v753_v39  ;;  %v848_v31 = vmul.f32 %v2176_v3, %v2176_v3 }
 0x1f7   : > { %v2135_v4 = vadd.f32 %v2072_v53, %v642_v9  ;;  %v730_v24 = vadd.f32 %v723_v0, %v715_v63 }
 0x1f8   : > { %v825_v8 = vadd.f32 %v818_v55, %v810_v54  ;;  %v787_v18 = vadd.f32 %v779_v51, %v770_v60 }
 0x1f9   : > { %v663_v23 = vrot.slane %v2135_v4, 7  ;;  %v688_v44 = vrot.slane %v2135_v4, 1  ;;  %v804_v62 = vmul.f32 %v2089_v14, %v2135_v4  ;;  %v763_v9 = vmul.f32 %v2081_v7, %v2135_v4 }
 0x1fa   : > { %v2187_v32 = vadd.f32 %v832_v58, %v825_v8  ;;  %v833_v34 = vadd.f32 %v787_v18, %v744_v22  ;;  %v745_v42 = vadd.f32 %v738_v26, %v730_v24  ;;  %v724_v43 = vmul.f32 %v2079_v6, %v2135_v4 }
 0x1fb   : > { %v680_v41 = vsel %vm674_vm8, 0.0, %v663_v23  ;;  %v705_v2 = vsel %vm699_vm9, %v688_v44, 0.0  ;;  %v892_v4 = vsel %vm888_vm11, %v848_v31, 0.0 }
 0x1fc   : > { %v796_v56 = vmul.f32 %v2087_v13, %v680_v41  ;;  %v754_v61 = vmul.f32 %v2084_v10, %v680_v41  ;;  %v819_v23 = vmul.f32 %v2105_v29, %v705_v2  ;;  %v780_v25 = vmul.f32 %v2096_v21, %v705_v2 }
 0x1fd   : > { %v716_v35 = vmul.f32 %v2077_v5, %v680_v41  ;;  %v849_v41 = vmul.f32 %v2187_v32, %v2187_v32  ;;  %v739_v8 = vmul.f32 %v2091_v16, %v705_v2 }
 0x1fe   : > { %v811_v11 = vadd.f32 %v804_v62, %v796_v56  ;;  %v771_v50 = vadd.f32 %v763_v9, %v754_v61  ;;  %v858_v56 = vsel %vm854_vm10, %v848_v31, 0.0 }
 0x1ff   : > { %v731_v51 = vadd.f32 %v724_v43, %v716_v35  ;;  %v860_v0 = vsel %vm854_vm10, %v849_v41, 0.0  ;;  %v894_v2 = vsel %vm888_vm11, %v849_v41, 0.0 }
 0x200   : > { %v826_v33 = vadd.f32 %v819_v23, %v811_v11  ;;  %v788_v40 = vadd.f32 %v780_v25, %v771_v50 }
 0x201   : > { %v746_v23 = vadd.f32 %v739_v8, %v731_v51 }
 0x202   : > { %v2201_v44 = vadd.f32 %v833_v34, %v826_v33  ;;  %v834_v37 = vadd.f32 %v788_v40, %v745_v42 }
 0x204   : > { %v645_v12 = vpop.f32.mrf.mxu3 }
 0x205   : > { %v646_v19 = vadd.f32 %v2072_v53, %v645_v12 }
 0x207   : > { %v664_v28 = vrot.slane %v646_v19, 7  ;;  %v689_v30 = vrot.slane %v646_v19, 1  ;;  %v805_v47 = vmul.f32 %v2089_v14, %v646_v19  ;;  %v764_v49 = vmul.f32 %v2081_v7, %v646_v19 }
 0x208   : > { %v725_v61 = vmul.f32 %v2079_v6, %v646_v19 }
 0x209   : > { %v681_v36 = vsel %vm674_vm8, 0.0, %v664_v28  ;;  %v706_v39 = vsel %vm699_vm9, %v689_v30, 0.0  ;;  %v859_v30 = vadd.f32 %v858_v56, %v857_v20 }
 0x20a   : > { %v755_v38 = vmul.f32 %v2084_v10, %v681_v36  ;;  %v797_v46 = vmul.f32 %v2087_v13, %v681_v36  ;;  %v820_v54 = vmul.f32 %v2105_v29, %v706_v39  ;;  %v717_v57 = vmul.f32 %v2077_v5, %v681_v36 }
 0x20b   : > { %v781_v62 = vmul.f32 %v2096_v21, %v706_v39  ;;  %v850_v5 = vmul.f32 %v2201_v44, %v2201_v44  ;;  %v740_v50 = vmul.f32 %v2091_v16, %v706_v39  ;;  %v861_v35 = vadd.f32 %v860_v0, %v859_v30 }
 0x20c   : > { %v812_v45 = vadd.f32 %v805_v47, %v797_v46  ;;  %v647_v55 = vpop.f32.mrf.mxu3  ;;  %v772_v59 = vadd.f32 %v764_v49, %v755_v38 }
 0x20d   : > { %v648_v60 = vadd.f32 %v2072_v53, %v647_v55  ;;  %v732_v53 = vadd.f32 %v725_v61, %v717_v57 }
 0x20e   : > { %v827_v52 = vadd.f32 %v820_v54, %v812_v45  ;;  %v789_v15 = vadd.f32 %v781_v62, %v772_v59 }
 0x20f   : > { %v665_v58 = vrot.slane %v648_v60, 7  ;;  %v690_v63 = vrot.slane %v648_v60, 1  ;;  %v765_v17 = vmul.f32 %v2081_v7, %v648_v60  ;;  %v806_v19 = vmul.f32 %v2089_v14, %v648_v60 }
 0x210   : > { %v2214_v9 = vadd.f32 %v834_v37, %v827_v52  ;;  %v893_v7 = vadd.f32 %v892_v4, %v891_v48  ;;  %v896_v14 = vsel %vm888_vm11, %v850_v5, 0.0  ;;  %v747_v33 = vadd.f32 %v740_v50, %v732_v53 }
 0x211   : > { %v682_v11 = vsel %vm674_vm8, 0.0, %v665_v58  ;;  %v707_v12 = vsel %vm699_vm9, %v690_v63, 0.0  ;;  %v835_v34 = vadd.f32 %v789_v15, %v746_v23 }
 0x212   : > { %v756_v6 = vmul.f32 %v2084_v10, %v682_v11  ;;  %v798_v18 = vmul.f32 %v2087_v13, %v682_v11  ;;  %v851_v22 = vmul.f32 %v2214_v9, %v2214_v9  ;;  %v782_v26 = vmul.f32 %v2096_v21, %v707_v12 }
 0x213   : > { %v821_v10 = vmul.f32 %v2105_v29, %v707_v12  ;;  %v862_v13 = vsel %vm854_vm10, %v850_v5, 0.0  ;;  %v895_v36 = vadd.f32 %v894_v2, %v893_v7 }
 0x214   : > { %v773_v24 = vadd.f32 %v765_v17, %v756_v6  ;;  %v813_v28 = vadd.f32 %v806_v19, %v798_v18  ;;  %v864_v21 = vsel %vm854_vm10, %v851_v22, 0.0  ;;  %v898_v29 = vsel %vm888_vm11, %v851_v22, 0.0 }
 0x215   : > { %v863_v20 = vadd.f32 %v862_v13, %v861_v35  ;;  %v897_v40 = vadd.f32 %v896_v14, %v895_v36 }
 0x216   : > { %v790_v31 = vadd.f32 %v782_v26, %v773_v24  ;;  %v828_v25 = vadd.f32 %v821_v10, %v813_v28  ;;  %v845_v28 = vld [vmem:[%s2339_s5] sm:$0x1] }
 0x217   : > { %v865_v48 = vadd.f32 %v864_v21, %v863_v20  ;;  %v899_v42 = vadd.f32 %v898_v29, %v897_v40 }
 0x218   : > { %v2230_v16 = vadd.f32 %v790_v31, %v747_v33  ;;  %v2232_v39 = vadd.f32 %v835_v34, %v828_v25 }
 0x21a   : > { %v852_v38 = vmul.f32 %v2232_v39, %v2232_v39  ;;  %v853_v46 = vmul.f32 %v2230_v16, %v2230_v16  ;;  %v1058_v47 = vpack.c.bf16 %v2230_v16, %v2232_v39 }
 0x21c   : > { %v866_v43 = vsel %vm854_vm10, %v852_v38, 0.0  ;;  %v900_v49 = vsel %vm888_vm11, %v852_v38, 0.0  ;;  %v902_v54 = vsel %vm888_vm11, %v853_v46, 0.0  ;;  %v868_v55 = vsel %vm854_vm10, %v853_v46, 0.0 }
 0x21d   : > { %v867_v41 = vadd.f32 %v866_v43, %v865_v48  ;;  %v901_v45 = vadd.f32 %v900_v49, %v899_v42 }
 0x21f   : > { %v903_v56 = vadd.f32 %v902_v54, %v901_v45  ;;  %v869_v57 = vadd.f32 %v868_v55, %v867_v41 }
 0x221   : > { %v904_v59 = vrot.slane %v903_v56, 4  ;;  %v870_v60 = vrot.slane %v869_v57, 4 }
 0x223   : > { %v905_v4 = vadd.f32 %v904_v59, %v903_v56  ;;  %v871_v51 = vadd.f32 %v870_v60, %v869_v57 }
 0x225   : > { %v906_v37 = vrot.slane %v905_v4, 2  ;;  %v872_v52 = vrot.slane %v871_v51, 2 }
 0x227   : > { %v907_v61 = vadd.f32 %v906_v37, %v905_v4  ;;  %v873_v62 = vadd.f32 %v872_v52, %v871_v51 }
 0x229   : > { %v908_v58 = vrot.slane %v907_v61, 1  ;;  %v874_v63 = vrot.slane %v873_v62, 1 }
 0x22b   : > { %v909_v0 = vadd.f32 %v908_v58, %v907_v61  ;;  %v875_v8 = vadd.f32 %v874_v63, %v873_v62  ;;  %v948_v61 = vld [vmem:[#allocation10] sm:$0xff] }
 0x22d   : > { %v910_v5 = vmax.f32 %v909_v0, 1e-24  ;;  %v876_v53 = vmax.f32 %v875_v8, 1e-24  ;;  %v949_v0 = vld [vmem:[#allocation10 + $0x8] sm:$0xff] }
 0x22f   : > { %1504 = vrsqrt.f32 %v910_v5  ;;  %vm917_vm14 = vweird.f32 %v910_v5  ;;  %vm883_vm1 = vweird.f32 %v876_v53 }
 0x230   : > { %1506 = vrsqrt.f32 %v876_v53 }
 0x235   : > { %v1505_v11 = vpop.eup %1504 }
 0x236   : > { %v1507_v12 = vpop.eup %1506  ;;  %v912_v15 = vmul.f32 %v1505_v11, %v910_v5  ;;  %vm918_vm12 = vweird.f32 %v1505_v11 }
 0x237   : > { %v878_v6 = vmul.f32 %v1507_v12, %v876_v53  ;;  %vm884_vm13 = vweird.f32 %v1507_v12  ;;  %vm919_vm15 = vmor %vm917_vm14, %vm918_vm12 }
 0x238   : > { %v913_v17 = vmul.f32 %v1505_v11, %v912_v15  ;;  %vm885_vm2 = vmor %vm883_vm1, %vm884_vm13  ;;  %v950_v15 = vld [vmem:[#allocation10 + $0x10] sm:$0xff] }
 0x239   : > { %v879_v18 = vmul.f32 %v1507_v12, %v878_v6 }
 0x23a   : > { %v914_v19 = vmul.f32 0.5, %v913_v17 }
 0x23b   : > { %v880_v2 = vmul.f32 0.5, %v879_v18 }
 0x23c   : > { %v915_v22 = vsub.f32 1.5, %v914_v19  ;;  %v951_v19 = vld [vmem:[#allocation10 + $0x18] sm:$0xff] }
 0x23d   : > { %v881_v50 = vsub.f32 1.5, %v880_v2 }
 0x23e   : > { %v916_v23 = vmul.f32 %v1505_v11, %v915_v22 }
 0x23f   : > { %v882_v24 = vmul.f32 %v1507_v12, %v881_v50 }
 0x240   : > { %v920_v26 = vsel %vm919_vm15, %v1505_v11, %v916_v23  ;;  %v1057_v11 = vpack.c.bf16 %v2214_v9, %v2201_v44 }
 0x241   : > { %v942_v10 = vmul.f32 %v920_v26, %v2232_v39  ;;  %v943_v30 = vmul.f32 %v920_v26, %v2230_v16  ;;  %v886_v7 = vsel %vm885_vm2, %v1507_v12, %v882_v24  ;;  %v938_v13 = vmul.f32 %v920_v26, %v2176_v3 }
 0x242   : > { %v939_v14 = vmul.f32 %v920_v26, %v2187_v32  ;;  %v887_v25 = vmul.f32 %v886_v7, %v845_v28  ;;  %v940_v35 = vmul.f32 %v920_v26, %v2201_v44  ;;  %v941_v36 = vmul.f32 %v920_v26, %v2214_v9 }
 0x243   : > { %v947_v31 = vpack.c.bf16 %v943_v30, %v942_v10  ;;  %v936_v21 = vmul.f32 %v920_v26, %v2128_v1  ;;  %v937_v29 = vmul.f32 %v920_v26, %v2146_v27  ;;  %v1056_v12 = vpack.c.bf16 %v2187_v32, %v2176_v3 }
 0x244   : > { %v945_v33 = vpack.c.bf16 %v939_v14, %v938_v13  ;;  %v922_v34 = vperm.slane %v887_v25, 0  ;;  %v946_v46 = vpack.c.bf16 %v941_v36, %v940_v35 }
 0x245   : > { %978 = vrot.lane.b32.xlu1 %v947_v31, %s1797_s2  ;;  %v944_v48 = vpack.c.bf16 %v937_v29, %v936_v21  ;;  %v1055_v31 = vpack.c.bf16 %v2146_v27, %v2128_v1 }
 0x246   : > { %974 = vrot.lane.b32.xlu2 %v945_v33, %s1797_s2  ;;  %v930_v20 = vmul.f32 %v922_v34, %v2232_v39  ;;  %v931_v40 = vmul.f32 %v922_v34, %v2230_v16  ;;  %v924_v42 = vmul.f32 %v922_v34, %v2128_v1  ;;  %v925_v43 = vmul.f32 %v922_v34, %v2146_v27 }
 0x247   : > { %v926_v41 = vmul.f32 %v922_v34, %v2176_v3  ;;  %v927_v45 = vmul.f32 %v922_v34, %v2187_v32  ;;  %v928_v55 = vmul.f32 %v922_v34, %v2201_v44  ;;  %v929_v56 = vmul.f32 %v922_v34, %v2214_v9 }
 0x248   : > { %v935_v38 = vpack.c.bf16 %v931_v40, %v930_v20  ;;  %v932_v49 = vpack.c.bf16 %v925_v43, %v924_v42 }
 0x249   : > { %v933_v54 = vpack.c.bf16 %v927_v45, %v926_v41  ;;  %v934_v57 = vpack.c.bf16 %v929_v56, %v928_v55 }
 0x24d   : > { %976 = vrot.lane.b32.xlu1 %v946_v46, %s1797_s2 }
 0x24e   : > { %972 = vrot.lane.b32.xlu2 %v944_v48, %s1797_s2 }
 0x282   : > { %952 = vxpose.xlu1.c.b16.start [1/4] (short) (narrow) %v932_v49, 32 }
 0x292   : > { %953 = vxpose.xlu1.c.b16.cont [2/4] (short) (narrow) %v933_v54, 32 }
 0x2a0   : > { %v975_v60 = vpop.permute.xlu2 %974 }
 0x2a2   : > { %954 = vxpose.xlu1.c.b16.cont [3/4] (short) (narrow) %v934_v57, 32 }
 0x2a8   : > { %v973_v51 = vpop.permute.xlu2 %972 }
 0x2b2   : > { %955 = vxpose.xlu1.c.b16.end [4/4] (short) (narrow) %v935_v38, 32 }
 0x2b7   : > { %v979_v59 = vpop.permute.xlu1 %978 }
 0x2b8   : > { %994 = vmatpush.bf16.msra.mxu1 %v979_v59 }
 0x2bf   : > { %v977_v4 = vpop.permute.xlu1 %976 }
 0x2c0   : > { %995 = vmatpush.bf16.msra.mxu1 %v977_v4 }
 0x2c4   : > { %996 = vmatpush.bf16.msra.mxu1 %v975_v60 }
 0x2c8   : > { %997 = vmatpush.bf16.msra.mxu1 %v973_v51 }
 0x32e   : > { %v960_v37 = vpop.trf.xlu1 }
 0x32f   : > { %1362 = vmatmul.msk.bf16.vlgmr.msra.gmra.mxu1 %vm443_vm0, %v960_v37 }
 0x33e   : > { %v961_v52 = vpop.trf.xlu1 }
 0x33f   : > { %1363 = vmatmul.msk.bf16.gmra.mxu1 %vm443_vm0, %v961_v52 }
 0x3ac   : > { %v999_v62 = vpop.f32.mrf.mxu1 }
 0x3ad   : > { %v1000_v58 = vadd.f32 %v999_v62, %v948_v61 }
 0x3af   : > { %v1009_v63 = vsel %vm854_vm10, %v1000_v58, -inf }
 0x3b0   : > { %1010 = vmax.xlane.f32.xlu2 %v1009_v63  ;;  %v1387_v63 = vld [vmem:[#allocation11] sm:$0xff] }
 0x3b4   : > { %v1001_v8 = vpop.f32.mrf.mxu1 }
 0x3b5   : > { %v1002_v5 = vadd.f32 %v1001_v8, %v949_v0  ;;  %v1388_v0 = vld [vmem:[#allocation11 + $0x8] sm:$0xff] }
 0x3b7   : > { %v1012_v53 = vsel %vm854_vm10, %v1002_v5, -inf }
 0x3b8   : > { %1013 = vmax.xlane.f32.xlu0 %v1012_v53 }
 0x3bc   : > { %v1004_v6 = vpop.f32.mrf.mxu1 }
 0x3bd   : > { %v1005_v17 = vadd.f32 %v1004_v6, %v950_v15 }
 0x3bf   : > { %v1015_v18 = vsel %vm854_vm10, %v1005_v17, -inf }
 0x3c4   : > { %v1006_v2 = vpop.f32.mrf.mxu1 }
 0x3c5   : > { %v1007_v16 = vadd.f32 %v1006_v2, %v951_v19 }
 0x3c7   : > { %v1018_v39 = vsel %vm854_vm10, %v1007_v16, -inf }
 0x3c8   : > { %1069 = vrot.lane.b32.xlu2 %v1058_v47, %s1798_s24 }
 0x3d0   : > { %1067 = vrot.lane.b32.xlu2 %v1057_v11, %s1798_s24 }
 0x3d8   : > { %1065 = vrot.lane.b32.xlu2 %v1056_v12, %s1798_s24 }
 0x401   : > { %1016 = vmax.xlane.f32.xlu2 %v1015_v18 }
 0x409   : > { %1019 = vmax.xlane.f32.xlu2 %v1018_v39 }
 0x423   : > { %v1011_v44 = vpop.xlane.xlu2 %1010 }
 0x424   : > { %v1021_v9 = vsub.f32 %v1000_v58, %v1011_v44 }
 0x426   : > { %v1025_v47 = vmul.f32 1.442695, %v1021_v9 }
 0x428   : > { %1508 = vpow2.f32 %v1025_v47 }
 0x42b   : > { %v1014_v22 = vpop.xlane.xlu0 %1013  ;;  %v1070_v3 = vpop.permute.xlu2 %1069 }
 0x42c   : > { %v1022_v32 = vsub.f32 %v1002_v5, %v1014_v22  ;;  %v1087_v50 = vsel %vm854_vm10, %v1070_v3, 0 }
 0x42d   : > { %1093 = vmatpush.bf16.xpose.msra.mxu2 %v1087_v50 }
 0x42e   : > { %v1509_v23 = vpop.eup %1508  ;;  %v1027_v24 = vmul.f32 1.442695, %v1022_v32 }
 0x42f   : > { %v1033_v26 = vsel %vm854_vm10, %v1509_v23, 0.0 }
 0x430   : > { %1510 = vpow2.f32 %v1027_v24  ;;  %1034 = vadd.xlane.f32.xlu2 %v1033_v26 }
 0x433   : > { %v1068_v28 = vpop.permute.xlu2 %1067 }
 0x434   : > { %v1084_v10 = vsel %vm854_vm10, %v1068_v28, 0 }
 0x435   : > { %1094 = vmatpush.bf16.xpose.msra.mxu2 %v1084_v10 }
 0x436   : > { %v1511_v30 = vpop.eup %1510 }
 0x437   : > { %v1036_v7 = vsel %vm854_vm10, %v1511_v30, 0.0 }
 0x438   : > { %1037 = vadd.xlane.f32.xlu1 %v1036_v7 }
 0x43b   : > { %v1066_v13 = vpop.permute.xlu2 %1065 }
 0x43c   : > { %v1081_v14 = vsel %vm854_vm10, %v1066_v13, 0 }
 0x43d   : > { %1095 = vmatpush.bf16.xpose.msra.mxu2 %v1081_v14 }
 0x448   : > { %1063 = vrot.lane.b32.xlu2 %v1055_v31, %s1798_s24 }
 0x474   : > { %v1017_v25 = vpop.xlane.xlu2 %1016 }
 0x475   : > { %v1023_v33 = vsub.f32 %v1005_v17, %v1017_v25 }
 0x477   : > { %v1029_v34 = vmul.f32 1.442695, %v1023_v33 }
 0x479   : > { %1512 = vpow2.f32 %v1029_v34 }
 0x47c   : > { %v1020_v35 = vpop.xlane.xlu2 %1019 }
 0x47d   : > { %v1024_v36 = vsub.f32 %v1007_v16, %v1020_v35 }
 0x47f   : > { %v1513_v21 = vpop.eup %1512  ;;  %v1031_v29 = vmul.f32 1.442695, %v1024_v36 }
 0x480   : > { %v1039_v20 = vsel %vm854_vm10, %v1513_v21, 0.0 }
 0x481   : > { %1514 = vpow2.f32 %v1031_v29  ;;  %1040 = vadd.xlane.f32.xlu0 %v1039_v20 }
 0x487   : > { %v1515_v40 = vpop.eup %1514 }
 0x488   : > { %v1042_v38 = vsel %vm854_vm10, %v1515_v40, 0.0 }
 0x489   : > { %1043 = vadd.xlane.f32.xlu0 %v1042_v38 }
 0x4a3   : > { %v1035_v46 = vpop.xlane.xlu2 %1034 }
 0x4a4   : > { %1516 = vrcp.f32 %v1035_v46 }
 0x4aa   : > { %v1517_v42 = vpop.eup %1516 }
 0x4ab   : > { %v1064_v1 = vpop.permute.xlu2 %1063  ;;  %v1038_v27 = vpop.xlane.xlu1 %1037  ;;  %v1049_v49 = vmul.f32 %v1517_v42, %v1509_v23 }
 0x4ac   : > { %1518 = vrcp.f32 %v1038_v27  ;;  %v1078_v48 = vsel %vm854_vm10, %v1064_v1, 0 }
 0x4ad   : > { %1096 = vmatpush.bf16.xpose.msra.mxu2 %v1078_v48 }
 0x4b2   : > { %v1519_v43 = vpop.eup %1518 }
 0x4b3   : > { %v1050_v41 = vmul.f32 %v1519_v43, %v1511_v30 }
 0x4b5   : > { %v1053_v45 = vpack.c.bf16 %v1050_v41, %v1049_v49 }
 0x4b7   : > { %1364 = vmatmul.msk.bf16.vlgmr.msra.gmra.mxu2 %vm854_vm10, %v1053_v45 }
 0x4f4   : > { %v1041_v54 = vpop.xlane.xlu0 %1040 }
 0x4f5   : > { %1520 = vrcp.f32 %v1041_v54 }
 0x4fb   : > { %v1521_v56 = vpop.eup %1520 }
 0x4fc   : > { %v1044_v55 = vpop.xlane.xlu0 %1043  ;;  %v1051_v59 = vmul.f32 %v1521_v56, %v1513_v21 }
 0x4fd   : > { %1522 = vrcp.f32 %v1044_v55 }
 0x503   : > { %v1523_v57 = vpop.eup %1522 }
 0x504   : > { %v1052_v60 = vmul.f32 %v1523_v57, %v1515_v40 }
 0x506   : > { %v1054_v4 = vpack.c.bf16 %v1052_v60, %v1051_v59 }
 0x508   : > { %1365 = vmatmul.msk.bf16.gmra.mxu2 %vm854_vm10, %v1054_v4 }
 0x53a   : > { %v1098_v51 = vpop.f32.mrf.mxu2 }
 0x542   : > { %v1100_v37 = vpop.f32.mrf.mxu2 }
 0x543   : > { %v1108_v58 = vpack.c.bf16 %v1100_v37, %v1098_v51 }
 0x58b   : > { %v1103_v52 = vpop.f32.mrf.mxu2 }
 0x593   : > { %v1105_v61 = vpop.f32.mrf.mxu2 }
 0x594   : > { %v1109_v62 = vpack.c.bf16 %v1105_v61, %v1103_v52 }
 0x596   : > { %1126 = vmatpush.bf16.msrb.mxu3 %v1109_v62 }
 0x59a   : > { %1127 = vmatpush.bf16.msrb.mxu3 %v1108_v58 }
 0x59d   : > { %1370 = vmatmul.msk.bf16.vlgmr.msrb.gmra.mxu3 %vm854_vm10, %v1387_v63 }
 0x59e   : > { %1151 = vmatpush.bf16.msra.mxu3 %v1109_v62 }
 0x5a2   : > { %1152 = vmatpush.bf16.msra.mxu3 %v1108_v58 }
 0x5ad   : > { %1375 = vmatmul.msk.bf16.vlgmr.msra.gmra.mxu3 %vm854_vm10, %v1388_v0 }
 0x620   : > { %v1129_v8 = vpop.f32.mrf.mxu3 }
 0x628   : > { %v1131_v5 = vpop.f32.mrf.mxu3 }
 0x630   : > { %v1154_v53 = vpop.f32.mrf.mxu3 }
 0x631   : > { %1161 = vrot.lane.b32.xlu2 %v1154_v53, %s1798_s24 }
 0x638   : > { %v1156_v11 = vpop.f32.mrf.mxu3 }
 0x639   : > { %1163 = vrot.lane.b32.xlu0 %v1156_v11, %s1798_s24 }
 0x68b   : > { %v1162_v12 = vpop.permute.xlu2 %1161 }
 0x68c   : > { %v1167_v15 = vsel %vm443_vm0, %v1129_v8, %v1162_v12 }
 0x68d   : > { %1169 = vst [vmem:[%s433_s13] sm:$0xff] %v1167_v15 }
 0x6ab   : > { %v1164_v6 = vpop.permute.xlu0 %1163 }
 0x6ac   : > { %v1168_v17 = vsel %vm443_vm0, %v1131_v5, %v1164_v6 }
 0x6ad   : > { %1170 = vst [vmem:[%s433_s13 + $0x8] sm:$0xff] %v1168_v17 }
 0x6ae   : > { %1731 = shalt.err (!%p1728_p11)
}
 0x6af   : > { %s1799_s19 = smov 128   ;;  %s1800_s4 = smov 8  }
 0x6b0   : > { %1414 = dma.vmem_to_hbm [thread:$0]  (%p1936_p3), %s1185_s7, 256, %s1187_s29, %s1172_s0, %s1799_s19, %s1799_s19, %s1800_s4  }
 0x6b1 PF: > { %s1201_s20 = sand.u32 1, %s1774_s27   ;;  %p2368_p12 = scmp.ge.s32.totalorder %s1786_s30, 2 }
 0x6b2   : > { %s1202_s2 = scalar_lea.sflag [#allocation4], %s1201_s20 }
 0x6b3   : > { %p1437_p13 = pnand %p2368_p12, %p1881_p6 }
 0x6b5   : > { %p1438_p0 = pneg %p1437_p13 }
 0x6b7   : > { %1769 = dma.done.wait (%p1438_p0), %s1202_s2, 256  }
 0x6b8   : > { %1771 = vsyncadd (%p1438_p0), %s1202_s2, 4294967040  ;;  %s2369_s24 = sld [smem:[#allocation20_spill]]  ;;  %p26_p5 = scmp.ge.s32.totalorder %s1926_s14, 4  }
 0x6b9   : > { %s2370_s29 = sld [smem:[#allocation21_spill]]  ;;  %s2371_s27 = smov %s1778_s28 }
 0x6ba   : > { %s2373_s30 = smov %s1926_s14  ;;  %28 = sbr.rel (!%p26_p5) target bundleno = 15 (0xf), region = 127 }
 0x6be   : > { %s2372_s28 = smov %s2369_s24 }
 0x6bf   :  { %1208 = vsyncpa [#allocation3], 1 }
 0x6c0   :  { %1210 = vsyncpa [#allocation3 + $0x1], 1 }
 0x6c1   :  { %1211 = vsyncpa [#allocation6], 1 }
 0x6c2   :  { %1213 = vsyncpa [#allocation6 + $0x1], 1 }
 0x6c3   :  { %1214 = vsyncpa [#allocation9], 1 }
 0x6c4   :  { %1215 = vsyncpa [#allocation12], 1 }
 0x6c5   :  { %1216 = vsyncpa [#allocation4], 1 }
 0x6c6   :  { %1218 = vsyncpa [#allocation4 + $0x1], 1 }

</bundles_post_ra>
